<compile_context>
chip_gen: v7x
topology: tpu7x:2x2x1
jax: 0.10.0
libtpu: 0.0.40
codegen_flags: <defaults>
</compile_context>

<pallas_src>
import functools

import jax
import jax.numpy as jnp
from jax import lax
from jax.experimental import pallas as pl
from jax.experimental.pallas import tpu as pltpu


def ctrgc_kernel(B, T, V, R, alpha,
                 x_ref, w12_ref, b12_ref, w3_ref, b3_ref, w4_ref, b4_ref,
                 a_ref, out_ref):
    """One grid step = B samples, NCHW-native layouts.

    x_ref   : (B, C_in, T*V)  f32
    w12_ref : (2R, C_in)      [conv1 | conv2] fused, pre-transposed
    w3_ref  : (C_out, C_in)   pre-transposed
    w4_ref  : (C_out, R)      pre-transposed
    b*_ref  : column vectors (rows = channels) -> broadcast over lanes
    a_ref   : (1, V*V) f32, lane order [v*V + u] = A[u, v]
    out_ref : (B, C_out, T*V) f32 (NCHW flattened -> lane-dense store)
    """
    C_out = w3_ref.shape[0]
    mxu = w12_ref.dtype
    inv_T = 1.0 / T

    w12 = w12_ref[...]
    w3 = w3_ref[...]
    w4 = w4_ref[...]
    b12 = b12_ref[...]
    b3 = b3_ref[...]
    b4 = b4_ref[...]
    a_vu = a_ref[...]

    for b in range(B):                                   # B is small (VMEM-chosen)
        xb = x_ref[b]                                    # (C_in, T*V) f32

        # ---- temporal mean hoisted before conv1/conv2 (exact by linearity).
        # T-slab accumulation over the flat lane axis: no (C,T,V) reshape relayout.
        msum = xb[:, 0:V]
        for t in range(1, T):
            msum = msum + xb[:, t * V:(t + 1) * V]
        m = msum * inv_T                                 # (C_in, V) f32

        # ---- fused conv1|conv2 on the mean (MXU): (2R, C_in) @ (C_in, V)
        m12 = jnp.dot(w12, m.astype(mxu),
                      preferred_element_type=jnp.float32) + b12      # (2R, V)
        m1 = m12[:R, :]                                  # m1[r, u]
        m2 = m12[R:, :]                                  # m2[r, v]

        # ---- pairwise diff + tanh, laid out so conv4 emits att at lane [v*V+u]
        # d[r, v, u] = tanh(m1[r, u] - m2[r, v])
        d = jnp.tanh(m1[:, None, :] - m2[:, :, None])    # (R, V, V) f32

        # ---- conv4 (MXU) + alpha + A: att[o, v*V+u] == att_pt[o, u, v]
        att = jnp.dot(w4, d.reshape(R, V * V).astype(mxu),
                      preferred_element_type=jnp.float32) + b4       # (C_out, V*V)
        att = att * alpha + a_vu                         # sublane-broadcast add of A

        # ---- conv3 (MXU) on the full (T*V) block: (C_out, C_in) @ (C_in, T*V)
        x3 = jnp.dot(w3, xb.astype(mxu),
                     preferred_element_type=jnp.float32) + b3        # (C_out, T*V)

        # ---- attention contraction on the MXU, batched over C_out:
        # out[o, t, u] = sum_v x3[o, t, v] * att[o, v*V + u]
        x3_3 = x3.reshape(C_out, T, V)
        att3 = att.reshape(C_out, V, V)
        ob = lax.dot_general(x3_3, att3,
                             dimension_numbers=(((2,), (1,)), ((0,), (0,))),
                             preferred_element_type=jnp.float32)     # (C_out, T, V)

        # lane-dense NCHW-flat store (full-width vst)
        out_ref[b] = ob.reshape(C_out, T * V).astype(out_ref.dtype)


def _pick_batch_block(N, T, V, C_in, C_out,
                      budget_bytes=20 * 1024 * 1024, max_b=8, min_grid_steps=2):
    """Largest divisor of N (<= max_b) whose working set fits the VMEM budget,
    while keeping >= min_grid_steps grid steps (megacore sharding on v7x)."""
    TV = T * V

    def est(b):
        x_blk = b * C_in * TV * 4 * 2                    # f32 input, double-buffered
        out_blk = b * C_out * TV * 4 * 2                 # f32 output, double-buffered
        # per-sample live values: x3 + its (C_out,T,V) copy + batched-dot result,
        # the x row itself, attention tensors.
        live = (3 * C_out * TV + C_in * TV + 2 * C_out * V * V) * 4
        return int((x_blk + out_blk + live) * 1.3)       # 30% headroom (review)

    steps_needed = min(min_grid_steps, N)
    best = 1
    for b in range(1, min(N, max_b) + 1):
        if N % b:
            continue
        if (N // b) < steps_needed:
            continue
        if est(b) <= budget_bytes:
            best = b
    return best


def ctrgc_forward(x, params, A, alpha=1.0, mxu_dtype=jnp.float32,
                  vmem_budget_bytes=20 * 1024 * 1024,
                  vmem_limit_bytes=32 * 1024 * 1024):
    """x: (N, C_in, T, V) float32 (PyTorch NCHW). Returns (N, C_out, T, V) float32.

    Per-generation tuning (review): v7x keep the 32 MiB limit / ~20 MiB budget
    (64 MiB VMEM, 2 TensorCores); v5e/v6e (128 MiB VMEM) can raise the budget to
    ~48-56 MiB and the limit to ~64 MiB; prefer mxu_dtype=bfloat16 on v6e/v7x.
    """
    N, C_in, T, V = x.shape
    w1, b1, w2, b2, w3, b3, w4, b4 = params
    R = w1.shape[1]
    C_out = w3.shape[1]

    # NCHW flattened — a pure reshape, no HBM transpose.
    xf = x.reshape(N, C_in, T * V).astype(jnp.float32)

    # Weights pre-transposed for the NCHW-orientation matmuls; conv1|conv2 fused.
    w12t = jnp.concatenate([w1, w2], axis=1).T.astype(mxu_dtype)     # (2R, C_in)
    b12c = jnp.concatenate([b1, b2], axis=0).reshape(2 * R, 1).astype(jnp.float32)
    w3t = w3.T.astype(mxu_dtype)                                     # (C_out, C_in)
    b3c = b3.reshape(C_out, 1).astype(jnp.float32)
    w4t = w4.T.astype(mxu_dtype)                                     # (C_out, R)
    b4c = b4.reshape(C_out, 1).astype(jnp.float32)
    # A pre-arranged to the in-kernel att lane layout: [v*V + u] = A[u, v]
    a_vu = A.T.reshape(1, V * V).astype(jnp.float32)

    B = _pick_batch_block(N, T, V, C_in, C_out, budget_bytes=vmem_budget_bytes)

    kern = functools.partial(ctrgc_kernel, B, T, V, R, float(alpha))
    out_flat = pl.pallas_call(
        kern,
        out_shape=jax.ShapeDtypeStruct((N, C_out, T * V), jnp.float32),
        grid_spec=pltpu.PrefetchScalarGridSpec(
            num_scalar_prefetch=0,
            grid=(N // B,),
            in_specs=[
                pl.BlockSpec((B, C_in, T * V), lambda n: (n, 0, 0)),
                pl.BlockSpec((2 * R, C_in), lambda n: (0, 0)),
                pl.BlockSpec((2 * R, 1), lambda n: (0, 0)),
                pl.BlockSpec((C_out, C_in), lambda n: (0, 0)),
                pl.BlockSpec((C_out, 1), lambda n: (0, 0)),
                pl.BlockSpec((C_out, R), lambda n: (0, 0)),
                pl.BlockSpec((C_out, 1), lambda n: (0, 0)),
                pl.BlockSpec((1, V * V), lambda n: (0, 0)),
            ],
            out_specs=pl.BlockSpec((B, C_out, T * V), lambda n: (n, 0, 0)),
        ),
        compiler_params=pltpu.CompilerParams(
            dimension_semantics=("parallel",),
            vmem_limit_bytes=vmem_limit_bytes,
        ),
    )(xf, w12t, b12c, w3t, b3c, w4t, b4c, a_vu)

    # Back to PyTorch NCHW (N, C_out, T, V) — a pure reshape, no HBM transpose.
    return out_flat.reshape(N, C_out, T, V)


def init_params(key, C_in, C_out, R):
    """kaiming_normal_(mode='fan_out') on 1x1 convs -> std = sqrt(2/out_ch); bias 0."""
    ks = jax.random.split(key, 4)
    w1 = jax.random.normal(ks[0], (C_in, R), jnp.float32) * jnp.sqrt(2.0 / R)
    w2 = jax.random.normal(ks[1], (C_in, R), jnp.float32) * jnp.sqrt(2.0 / R)
    w3 = jax.random.normal(ks[2], (C_in, C_out), jnp.float32) * jnp.sqrt(2.0 / C_out)
    w4 = jax.random.normal(ks[3], (R, C_out), jnp.float32) * jnp.sqrt(2.0 / C_out)
    b1 = jnp.zeros((R,), jnp.float32)
    b2 = jnp.zeros((R,), jnp.float32)
    b3 = jnp.zeros((C_out,), jnp.float32)
    b4 = jnp.zeros((C_out,), jnp.float32)
    return (w1, b1, w2, b2, w3, b3, w4, b4)


def ctrgc_ref(x, params, A, alpha=1.0):
    """Pure-JAX reference matching the PyTorch forward (f32-accurate matmuls)."""
    w1, b1, w2, b2, w3, b3, w4, b4 = params
    hp = jax.lax.Precision.HIGHEST
    x1 = jnp.einsum('nctv,cr->nrtv', x, w1, precision=hp) + b1[None, :, None, None]
    x2 = jnp.einsum('nctv,cr->nrtv', x, w2, precision=hp) + b2[None, :, None, None]
    x3 = jnp.einsum('nctv,co->notv', x, w3, precision=hp) + b3[None, :, None, None]
    x1 = x1.mean(axis=2)                                            # (N, R, V)
    x2 = x2.mean(axis=2)                                            # (N, R, V)
    d = jnp.tanh(x1[..., :, None] - x2[..., None, :])               # (N, R, V, V)
    att = jnp.einsum('nruv,ro->nouv', d, w4, precision=hp) + b4[None, :, None, None]
    att = att * alpha + A[None, None]
    return jnp.einsum('nouv,notv->notu', att, x3, precision=hp)     # (N, C_out, T, V)


if __name__ == "__main__":
    key = jax.random.PRNGKey(0)
    # in_channels == 3 hits the PyTorch special branch: rel_channels = 8
    N, C_in, C_out, T, V = 2, 3, 16, 8, 16
    R = 8

    kx, ka, kp = jax.random.split(key, 3)
    x = jax.random.normal(kx, (N, C_in, T, V), jnp.float32)
    A = jax.random.normal(ka, (V, V), jnp.float32)
    params = init_params(kp, C_in, C_out, R)

    ref = ctrgc_ref(x, params, A, alpha=1.0)

    # f32 MXU path (default) — tight tolerance vs. f32-accurate reference
    out = jax.block_until_ready(ctrgc_forward(x, params, A, alpha=1.0))
    assert out.shape == (N, C_out, T, V)
    max_err = float(jnp.max(jnp.abs(out - ref)))
    assert jnp.allclose(out, ref, atol=1e-3, rtol=1e-3), max_err

    # bf16 MXU operands (v6e/v7x suggestion): x stays f32 into the kernel, only
    # weights / matmul operands are cast; f32 accumulation throughout.
    out_bf16 = jax.block_until_ready(
        ctrgc_forward(x, params, A, alpha=1.0, mxu_dtype=jnp.bfloat16))
    assert out_bf16.shape == (N, C_out, T, V)
    assert bool(jnp.all(jnp.isfinite(out_bf16)))
    assert jnp.allclose(out_bf16, ref, atol=1e-1, rtol=1e-1), \
        float(jnp.max(jnp.abs(out_bf16 - ref)))

    print("KERNEL_OK")
</pallas_src>

<mosaic_0001>
module attributes {stable_mosaic.version = 11 : i64} {
  func.func @ctrgc_kernel(%arg0: i32, %arg1: memref<1x3x128xf32, #tpu.memory_space<vmem>>, %arg2: memref<16x3xf32, #tpu.memory_space<vmem>>, %arg3: memref<16x1xf32, #tpu.memory_space<vmem>>, %arg4: memref<16x3xf32, #tpu.memory_space<vmem>>, %arg5: memref<16x1xf32, #tpu.memory_space<vmem>>, %arg6: memref<16x8xf32, #tpu.memory_space<vmem>>, %arg7: memref<16x1xf32, #tpu.memory_space<vmem>>, %arg8: memref<1x256xf32, #tpu.memory_space<vmem>>, %arg9: memref<1x16x128xf32, #tpu.memory_space<vmem>>) attributes {dimension_semantics = [#tpu.dimension_semantics<parallel>], iteration_bounds = array<i64: 2>, scalar_prefetch = 0 : i64, scratch_operands = 0 : i64, tpu.core_type = #tpu.core_type<tc>, window_params = [{transform_indices = @transform_0, window_bounds = array<i64: 1, 3, 128>}, {pipeline_mode = #tpu.pipeline_mode<synchronous>, transform_indices = @transform_1, window_bounds = array<i64: 16, 3>}, {pipeline_mode = #tpu.pipeline_mode<synchronous>, transform_indices = @transform_2, window_bounds = array<i64: 16, 1>}, {pipeline_mode = #tpu.pipeline_mode<synchronous>, transform_indices = @transform_3, window_bounds = array<i64: 16, 3>}, {pipeline_mode = #tpu.pipeline_mode<synchronous>, transform_indices = @transform_4, window_bounds = array<i64: 16, 1>}, {pipeline_mode = #tpu.pipeline_mode<synchronous>, transform_indices = @transform_5, window_bounds = array<i64: 16, 8>}, {pipeline_mode = #tpu.pipeline_mode<synchronous>, transform_indices = @transform_6, window_bounds = array<i64: 16, 1>}, {pipeline_mode = #tpu.pipeline_mode<synchronous>, transform_indices = @transform_7, window_bounds = array<i64: 1, 256>}, {transform_indices = @transform_8, window_bounds = array<i64: 1, 16, 128>}]} {
    %c0 = arith.constant 0 : index
    %c0_0 = arith.constant 0 : index
    %0 = vector.load %arg2[%c0, %c0_0] : memref<16x3xf32, #tpu.memory_space<vmem>>, vector<16x3xf32>
    %c0_1 = arith.constant 0 : index
    %c0_2 = arith.constant 0 : index
    %1 = vector.load %arg4[%c0_1, %c0_2] : memref<16x3xf32, #tpu.memory_space<vmem>>, vector<16x3xf32>
    %c0_3 = arith.constant 0 : index
    %c0_4 = arith.constant 0 : index
    %2 = vector.load %arg6[%c0_3, %c0_4] : memref<16x8xf32, #tpu.memory_space<vmem>>, vector<16x8xf32>
    %c0_5 = arith.constant 0 : index
    %c0_6 = arith.constant 0 : index
    %3 = vector.load %arg3[%c0_5, %c0_6] : memref<16x1xf32, #tpu.memory_space<vmem>>, vector<16x1xf32>
    %c0_7 = arith.constant 0 : index
    %c0_8 = arith.constant 0 : index
    %4 = vector.load %arg5[%c0_7, %c0_8] : memref<16x1xf32, #tpu.memory_space<vmem>>, vector<16x1xf32>
    %c0_9 = arith.constant 0 : index
    %c0_10 = arith.constant 0 : index
    %5 = vector.load %arg7[%c0_9, %c0_10] : memref<16x1xf32, #tpu.memory_space<vmem>>, vector<16x1xf32>
    %c0_11 = arith.constant 0 : index
    %c0_12 = arith.constant 0 : index
    %6 = vector.load %arg8[%c0_11, %c0_12] : memref<1x256xf32, #tpu.memory_space<vmem>>, vector<1x256xf32>
    %c0_13 = arith.constant 0 : index
    %c0_14 = arith.constant 0 : index
    %c0_15 = arith.constant 0 : index
    %7 = vector.load %arg1[%c0_13, %c0_14, %c0_15] : memref<1x3x128xf32, #tpu.memory_space<vmem>>, vector<1x3x128xf32>
    %8 = vector.shape_cast %7 : vector<1x3x128xf32> to vector<3x128xf32>
    %9 = vector.extract_strided_slice %8 {offsets = [0, 0], sizes = [3, 16], strides = [1, 1]} : vector<3x128xf32> to vector<3x16xf32>
    %10 = vector.extract_strided_slice %8 {offsets = [0, 16], sizes = [3, 16], strides = [1, 1]} : vector<3x128xf32> to vector<3x16xf32>
    %11 = arith.addf %9, %10 : vector<3x16xf32>
    %12 = vector.extract_strided_slice %8 {offsets = [0, 32], sizes = [3, 16], strides = [1, 1]} : vector<3x128xf32> to vector<3x16xf32>
    %13 = arith.addf %11, %12 : vector<3x16xf32>
    %14 = vector.extract_strided_slice %8 {offsets = [0, 48], sizes = [3, 16], strides = [1, 1]} : vector<3x128xf32> to vector<3x16xf32>
    %15 = arith.addf %13, %14 : vector<3x16xf32>
    %16 = vector.extract_strided_slice %8 {offsets = [0, 64], sizes = [3, 16], strides = [1, 1]} : vector<3x128xf32> to vector<3x16xf32>
    %17 = arith.addf %15, %16 : vector<3x16xf32>
    %18 = vector.extract_strided_slice %8 {offsets = [0, 80], sizes = [3, 16], strides = [1, 1]} : vector<3x128xf32> to vector<3x16xf32>
    %19 = arith.addf %17, %18 : vector<3x16xf32>
    %20 = vector.extract_strided_slice %8 {offsets = [0, 96], sizes = [3, 16], strides = [1, 1]} : vector<3x128xf32> to vector<3x16xf32>
    %21 = arith.addf %19, %20 : vector<3x16xf32>
    %22 = vector.extract_strided_slice %8 {offsets = [0, 112], sizes = [3, 16], strides = [1, 1]} : vector<3x128xf32> to vector<3x16xf32>
    %23 = arith.addf %21, %22 : vector<3x16xf32>
    %cst = arith.constant 1.250000e-01 : f32
    %24 = vector.broadcast %cst : f32 to vector<3x16xf32>
    %25 = arith.mulf %23, %24 : vector<3x16xf32>
    %cst_16 = arith.constant dense<0.000000e+00> : vector<16x16xf32>
    %26 = tpu.matmul %0, %25, %cst_16 {dimension_numbers = #tpu.dot_dimension_numbers<[1], [0], [0], [1], [0, 0, 1, 1], [], []>} : vector<16x3xf32>, vector<3x16xf32>, vector<16x16xf32> -> vector<16x16xf32>
    %27 = vector.broadcast %3 : vector<16x1xf32> to vector<16x16xf32>
    %28 = arith.addf %26, %27 : vector<16x16xf32>
    %29 = vector.extract_strided_slice %28 {offsets = [0, 0], sizes = [8, 16], strides = [1, 1]} : vector<16x16xf32> to vector<8x16xf32>
    %30 = vector.extract_strided_slice %28 {offsets = [8, 0], sizes = [8, 16], strides = [1, 1]} : vector<16x16xf32> to vector<8x16xf32>
    %31 = vector.shape_cast %29 : vector<8x16xf32> to vector<8x1x16xf32>
    %32 = vector.shape_cast %30 : vector<8x16xf32> to vector<8x16x1xf32>
    %33 = vector.broadcast %31 : vector<8x1x16xf32> to vector<8x16x16xf32>
    %34 = vector.broadcast %32 : vector<8x16x1xf32> to vector<8x16x16xf32>
    %35 = arith.subf %33, %34 : vector<8x16x16xf32>
    %36 = math.tanh %35 : vector<8x16x16xf32>
    %37 = vector.shape_cast %36 : vector<8x16x16xf32> to vector<8x256xf32>
    %cst_17 = arith.constant dense<0.000000e+00> : vector<16x256xf32>
    %38 = tpu.matmul %2, %37, %cst_17 {dimension_numbers = #tpu.dot_dimension_numbers<[1], [0], [0], [1], [0, 0, 1, 1], [], []>} : vector<16x8xf32>, vector<8x256xf32>, vector<16x256xf32> -> vector<16x256xf32>
    %39 = vector.broadcast %5 : vector<16x1xf32> to vector<16x256xf32>
    %40 = arith.addf %38, %39 : vector<16x256xf32>
    %cst_18 = arith.constant 1.000000e+00 : f32
    %41 = vector.broadcast %cst_18 : f32 to vector<16x256xf32>
    %42 = arith.mulf %40, %41 : vector<16x256xf32>
    %43 = vector.broadcast %6 : vector<1x256xf32> to vector<16x256xf32>
    %44 = arith.addf %42, %43 : vector<16x256xf32>
    %cst_19 = arith.constant dense<0.000000e+00> : vector<16x128xf32>
    %45 = tpu.matmul %1, %8, %cst_19 {dimension_numbers = #tpu.dot_dimension_numbers<[1], [0], [0], [1], [0, 0, 1, 1], [], []>} : vector<16x3xf32>, vector<3x128xf32>, vector<16x128xf32> -> vector<16x128xf32>
    %46 = vector.broadcast %4 : vector<16x1xf32> to vector<16x128xf32>
    %47 = arith.addf %45, %46 : vector<16x128xf32>
    %48 = vector.shape_cast %47 : vector<16x128xf32> to vector<16x8x16xf32>
    %49 = vector.shape_cast %44 : vector<16x256xf32> to vector<16x16x16xf32>
    %cst_20 = arith.constant dense<0.000000e+00> : vector<16x8x16xf32>
    %50 = tpu.matmul %48, %49, %cst_20 {dimension_numbers = #tpu.dot_dimension_numbers<[2], [1], [1], [2], [0, 0, 0, 1, 1, 2], [0], [0]>} : vector<16x8x16xf32>, vector<16x16x16xf32>, vector<16x8x16xf32> -> vector<16x8x16xf32>
    %51 = vector.shape_cast %50 : vector<16x8x16xf32> to vector<16x128xf32>
    %c0_21 = arith.constant 0 : index
    %c0_22 = arith.constant 0 : index
    %c0_23 = arith.constant 0 : index
    %52 = vector.load %arg9[%c0_21, %c0_22, %c0_23] : memref<1x16x128xf32, #tpu.memory_space<vmem>>, vector<1x16x128xf32>
    %53 = vector.shape_cast %52 : vector<1x16x128xf32> to vector<16x128xf32>
    %54 = vector.shape_cast %51 : vector<16x128xf32> to vector<1x16x128xf32>
    tpu.vector_store %arg9[%c0_21, %c0_22, %c0_23], %54 {strides = array<i32>} : memref<1x16x128xf32, #tpu.memory_space<vmem>>, vector<1x16x128xf32>,
    return
  }
  func.func @transform_0(%arg0: i32) -> (i32, i32, i32) {
    %c0_i32 = arith.constant 0 : i32
    %c0_i32_0 = arith.constant 0 : i32
    %c0_i32_1 = arith.constant 0 : i32
    return %arg0, %c0_i32, %c0_i32_0 : i32, i32, i32
  }
  func.func @transform_1(%arg0: i32) -> (i32, i32) {
    %c0_i32 = arith.constant 0 : i32
    %c0_i32_0 = arith.constant 0 : i32
    %c0_i32_1 = arith.constant 0 : i32
    return %c0_i32, %c0_i32_0 : i32, i32
  }
  func.func @transform_2(%arg0: i32) -> (i32, i32) {
    %c0_i32 = arith.constant 0 : i32
    %c0_i32_0 = arith.constant 0 : i32
    %c0_i32_1 = arith.constant 0 : i32
    return %c0_i32, %c0_i32_0 : i32, i32
  }
  func.func @transform_3(%arg0: i32) -> (i32, i32) {
    %c0_i32 = arith.constant 0 : i32
    %c0_i32_0 = arith.constant 0 : i32
    %c0_i32_1 = arith.constant 0 : i32
    return %c0_i32, %c0_i32_0 : i32, i32
  }
  func.func @transform_4(%arg0: i32) -> (i32, i32) {
    %c0_i32 = arith.constant 0 : i32
    %c0_i32_0 = arith.constant 0 : i32
    %c0_i32_1 = arith.constant 0 : i32
    return %c0_i32, %c0_i32_0 : i32, i32
  }
  func.func @transform_5(%arg0: i32) -> (i32, i32) {
    %c0_i32 = arith.constant 0 : i32
    %c0_i32_0 = arith.constant 0 : i32
    %c0_i32_1 = arith.constant 0 : i32
    return %c0_i32, %c0_i32_0 : i32, i32
  }
  func.func @transform_6(%arg0: i32) -> (i32, i32) {
    %c0_i32 = arith.constant 0 : i32
    %c0_i32_0 = arith.constant 0 : i32
    %c0_i32_1 = arith.constant 0 : i32
    return %c0_i32, %c0_i32_0 : i32, i32
  }
  func.func @transform_7(%arg0: i32) -> (i32, i32) {
    %c0_i32 = arith.constant 0 : i32
    %c0_i32_0 = arith.constant 0 : i32
    %c0_i32_1 = arith.constant 0 : i32
    return %c0_i32, %c0_i32_0 : i32, i32
  }
  func.func @transform_8(%arg0: i32) -> (i32, i32, i32) {
    %c0_i32 = arith.constant 0 : i32
    %c0_i32_0 = arith.constant 0 : i32
    %c0_i32_1 = arith.constant 0 : i32
    return %arg0, %c0_i32, %c0_i32_0 : i32, i32, i32
  }
}

</mosaic_0001>

<bundles_post_ra>
// kernel: tpu_custom_call.1
= control target key start
LH: loop header
LB: loop body
LE: loop exit
PB: predicated region body
PF: predicated region fallthrough
CT: control target
= control target key end

     0   :  { %13 = vsyncpa [#allocation3], 0  ;;  %s5065_s0 = inlined_call_operand.vmem [shape: f32[2,3,128], index: 0, kind: input, shape index: {}]   ;;  %s5066_s1 = inlined_call_operand.vmem [shape: f32[16,3], index: 1, kind: input, shape index: {}]   ;;  %s5067_s2 = inlined_call_operand.vmem [shape: f32[16,1], index: 2, kind: input, shape index: {}]   ;;  %s5068_s3 = inlined_call_operand.vmem [shape: f32[16,3], index: 3, kind: input, shape index: {}]   ;;  %s5069_s4 = inlined_call_operand.vmem [shape: f32[16,1], index: 4, kind: input, shape index: {}]   ;;  %s5070_s5 = inlined_call_operand.vmem [shape: f32[16,8], index: 5, kind: input, shape index: {}]   ;;  %s5071_s6 = inlined_call_operand.vmem [shape: f32[16,1], index: 6, kind: input, shape index: {}]   ;;  %s5072_s7 = inlined_call_operand.vmem [shape: f32[1,256], index: 7, kind: input, shape index: {}]   ;;  %s5073_s8 = inlined_call_operand.hbm [shape: f32[2,16,128], index: 8, kind: output, shape index: {}]  }
   0x1   :  { %15 = vsyncpa [#allocation3 + $0x1], 0  ;;  %s4213_s27 = smov 0   ;;  %s4215_s28 = smov 0  }
   0x2   :  { %s4217_s29 = smov 0   ;;  %s4219_s30 = smov 0  }
   0x3 LB: > { %s4234_s9 = sadd.s32 4294967295, %s4149_s30   ;;  %s3738_s10 = sadd.s32 4294967294, %s4149_s30   ;;  %s4149_s30 = sphi %s4219_s30, %s5079_s30   ;;  %s4145_s29 = sphi %s4217_s29, %s5078_s29   ;;  %s4141_s28 = sphi %s4215_s28, %s5077_s28   ;;  %s4137_s27 = sphi %s4213_s27, %s5076_s27  }
   0x4   : > { %s4238_s11 = sadd.s32 1, %s4149_s30   ;;  %s201_s12 = sadd.s32 1, %s4145_s29 }
   0x5   : > { %s198_s13 = ssub.s32 %s4149_s30, %s4238_s11  ;;  %p211_p0 = scmp.ne.s32.totalorder %s4145_s29, %s4141_s28 }
   0x6   : > { %p199_p1 = scmp.eq.s32.totalorder %s198_s13, 0  ;;  %p212_p2 = scmp.eq.s32.totalorder %s4234_s9, 1 }
   0x7   : > { %p217_p3 = scmp.ne.s32.totalorder %s4141_s28, %s4137_s27  ;;  %p218_p4 = scmp.eq.s32.totalorder %s3738_s10, 1 }
   0x8   : > { %s4249_s14 = scalar_select %p199_p1, %s4145_s29, %s201_s12  }
   0x9   : > { %p4251_p5 = por %p212_p2, %p211_p0  ;;  %p4255_p6 = por %p218_p4, %p217_p3 }
   0xa   : > { %p3741_p7 = scmp.ge.s32.totalorder %s4149_s30, 1  ;;  %p264_p8 = scmp.lt.s32.totalorder %s4149_s30, 3 }
   0xc   : > { %p265_p9 = pnand %p3741_p7, %p264_p8 }
   0xd   : > { %p297_p10 = scmp.lt.s32.totalorder (!%p265_p9), %s4234_s9, 1  ;;  %s4151_s22 = smov (!%p265_p9), 112   ;;  %v301_v1 = vld [vmem:[%s5066_s1] sm:$0xff] (!%p265_p9)  ;;  %vm355_vm0 = vcmask (!%p265_p9), 23552   ;;  %v4157_v2 = vmov (!%p265_p9), 0   ;;  %v308_v3 = vld [vmem:[%s5067_s2 + $0x8] sm:$0xff] (!%p265_p9)  ;;  %v446_v23 = vlaneseq (!%p265_p9) }
   0xe   : > { %268 = sbr.rel (%p265_p9) target bundleno = 1478 (0x5c6), region = 52  ;;  %s4152_s23 = smov (!%p265_p9), 80   ;;  %3830 = vmatprep.mubr.msk.f32.mxu0 (!%p265_p9), %vm355_vm0, %v301_v1  ;;  %4053 = vset.pattern.permute.xlu1 (!%p265_p9), %v4157_v2  ;;  %v307_v4 = vld [vmem:[%s5067_s2] sm:$0xff] (!%p265_p9)  ;;  %vm362_vm1 = vcmask (!%p265_p9), 1042432   ;;  %v302_v20 = vld [vmem:[%s5066_s1 + $0x8] sm:$0xff] (!%p265_p9)  ;;  %vm979_vm2 = vcmask (!%p265_p9), 130048  }
   0xf   : > { %s4153_s24 = smov (!%p265_p9), 96   ;;  %s4154_s25 = smov (!%p265_p9), 64   ;;  %4054 = vset.pattern.permute.xlu0 (!%p265_p9), %v4157_v2  ;;  %v303_v21 = vld [vmem:[%s5068_s3] sm:$0xff] (!%p265_p9)  ;;  %v304_v22 = vld [vmem:[%s5068_s3 + $0x8] sm:$0xff] (!%p265_p9)  ;;  %v4159_v24 = vmov (!%p265_p9), 1966171168  }
  0x10   : > { %s4155_s12 = smov (!%p265_p9), 48   ;;  %s4156_s13 = smov (!%p265_p9), 32   ;;  %v444_v25 = vunpack.c.l.s4 (!%p265_p9), %v4159_v24  ;;  %v4295_v26 = vshrl.u32 (!%p265_p9), %v446_v23, 7  ;;  %vm981_vm3 = vcmask (!%p265_p9), 261120   ;;  %vm983_vm4 = vcmask (!%p265_p9), 392192  }
  0x11   : > { %s4158_s19 = smov (!%p265_p9), 16   ;;  %vm985_vm5 = vcmask (!%p265_p9), 523264   ;;  %vm987_vm6 = vcmask (!%p265_p9), 654336   ;;  %vm989_vm7 = vcmask (!%p265_p9), 785408   ;;  %vm991_vm8 = vcmask (!%p265_p9), 916480   ;;  %s4165_s20 = smov (!%p265_p9), [#allocation2]  }
  0x12   : > { %v445_v27 = vunpack.c.0.s8 (!%p265_p9), %v444_v25  ;;  %v515_v30 = vsub.s32 (!%p265_p9), 2, %v4295_v26  ;;  %v4299_v31 = vsub.s32 (!%p265_p9), 0, %v4295_v26  ;;  %v537_v39 = vsub.s32 (!%p265_p9), 4, %v4295_v26 }
  0x13   : > { %v504_v40 = vsub.s32 (!%p265_p9), 1, %v4295_v26  ;;  %v559_v48 = vsub.s32 (!%p265_p9), 6, %v4295_v26  ;;  %v526_v49 = vsub.s32 (!%p265_p9), 3, %v4295_v26  ;;  %v548_v55 = vsub.s32 (!%p265_p9), 5, %v4295_v26 }
  0x14   : > { %v448_v33 = vsub.s32 (!%p265_p9), %v445_v27, %v4295_v26  ;;  %v570_v58 = vsub.s32 (!%p265_p9), 7, %v4295_v26  ;;  %vm1010_vm9 = vcmask (!%p265_p9), 64512   ;;  %vm4164_vm10 = vmmov (!%p265_p9), 0  }
  0x15   : > { %s298_s17 = scalar_select %p297_p10, %s4234_s9, 1 }
  0x17   : > { %s3743_s18 = sshll.u32 %s298_s17, 2  ;;  %s294_s17 = sand.u32 1, %s4141_s28  }
  0x18   : > { %s300_s21 = scalar_lea.vmem %s5065_s0, %s3743_s18 }
  0x19   : > { %v314_v0 = vld [vmem:[%s300_s21] sm:$0x7]  ;;  %s4091_s21 = sshll.u32 %s4165_s20, 4  ;;  %s4092_s21 = int_to_ptr.vmem [resolvable:$false] %s4091_s21 }
  0x1a   : > { %316 = vrot.lane.b32.xlu0 %v314_v0, %s4151_s22  ;;  %324 = vrot.lane.b32.xlu1 %v314_v0, %s4152_s23  ;;  %s4093_s26 = scalar_lea.vmem %s4092_s21, 512 }
  0x1e   : > { %320 = vrot.lane.b32.xlu0 %v314_v0, %s4153_s24  ;;  %328 = vrot.lane.b32.xlu1 %v314_v0, %s4154_s25 }
  0x22   : > { %332 = vrot.lane.b32.xlu0 %v314_v0, %s4155_s12  ;;  %336 = vrot.lane.b32.xlu1 %v314_v0, %s4156_s13 }
  0x26   : > { %340 = vrot.lane.b32.xlu0 %v314_v0, %s4158_s19  ;;  %352 = vperm.xlu1 %4053, %v308_v3  }
  0x2a   : > { %347 = vperm.xlu0 %4054, %v307_v4  }
  0x8c   : > { %v317_v5 = vpop.permute.xlu0 %316  ;;  %v325_v6 = vpop.permute.xlu1 %324 }
  0x8d   : > { %v319_v7 = vadd.f32 %v317_v5, %v314_v0 }
  0x90   : > { %v321_v8 = vpop.permute.xlu0 %320  ;;  %v329_v9 = vpop.permute.xlu1 %328 }
  0x91   : > { %v323_v10 = vadd.f32 %v321_v8, %v319_v7 }
  0x93   : > { %v327_v11 = vadd.f32 %v325_v6, %v323_v10 }
  0x94   : > { %v333_v12 = vpop.permute.xlu0 %332  ;;  %v337_v14 = vpop.permute.xlu1 %336 }
  0x95   : > { %v331_v13 = vadd.f32 %v329_v9, %v327_v11 }
  0x97   : > { %v335_v15 = vadd.f32 %v333_v12, %v331_v13 }
  0x98   : > { %v341_v16 = vpop.permute.xlu0 %340 }
  0x99   : > { %v339_v17 = vadd.f32 %v337_v14, %v335_v15  ;;  %v4160_v14 = vmov 1983009808  }
  0x9a   : > { %v654_v15 = vunpack.c.l.s4 %v4160_v14 }
  0x9b   : > { %v343_v18 = vadd.f32 %v341_v16, %v339_v17 }
  0x9c   : > { %v655_v25 = vunpack.c.0.s8 %v654_v15 }
  0x9d   : > { %v344_v19 = vmul.f32 0.125, %v343_v18 }
  0x9f   : > { %3828 = vmatprep.subr.msk.mxu0 %vm362_vm1, %v344_v19 }
  0xa0   : > { %3829 = vmatpush3.msk.msra.mxu0 %vm362_vm1, %v344_v19 }
  0xa1   : > { %3831 = vmatmul.mubr.msk.f32.vlgmr.msra.gmra.mrb[0].mxu0 %vm355_vm0, %v302_v20  ;;  %3833 = vmatprep.subr.msk.mxu0 %vm362_vm1, %v314_v0 }
  0xa2   : > { %3834 = vmatpush3.msk.msra.mxu0 %vm362_vm1, %v314_v0  ;;  %3835 = vmatprep.mubr.msk.f32.mxu0 %vm355_vm0, %v303_v21 }
  0xa5   : > { %3836 = vmatmul.mubr.msk.f32.vlgmr.msra.gmra.mrb[2].mxu0 %vm355_vm0, %v304_v22  ;;  %v353_v28 = vpop.permute.xlu1 %352 }
  0xa9   : > { %v348_v29 = vpop.permute.xlu0 %347 }
 0x174   : > { %v3832_v32 = vpop.f32.mrb[0].mxu0 }
 0x175   : > { %v438_v34 = vadd.f32 %v3832_v32, %v353_v28  ;;  %v432_v35 = vpop.f32.mrb[1].mxu0 }
 0x176   : > { %v433_v36 = vadd.f32 %v432_v35, %v348_v29 }
 0x177   : > { %v516_v37 = vrot.slane %v438_v34, %v515_v30  ;;  %v494_v38 = vrot.slane %v438_v34, %v4299_v31  ;;  %v538_v46 = vrot.slane %v438_v34, %v537_v39  ;;  %v505_v47 = vrot.slane %v438_v34, %v504_v40 }
 0x178   : > { %v442_v41 = vcombine.high %v433_v36, %v433_v36  ;;  %v449_v42 = vrot.slane %v433_v36, %v448_v33  ;;  %v560_v53 = vrot.slane %v438_v34, %v559_v48  ;;  %v527_v54 = vrot.slane %v438_v34, %v526_v49 }
 0x179   : > { %522 = vbcast.lane.b32.xlu0 %v516_v37, 264  ;;  %500 = vbcast.lane.b32.xlu1 %v494_v38, 264  ;;  %v549_v57 = vrot.slane %v438_v34, %v548_v55  ;;  %v571_v59 = vrot.slane %v438_v34, %v570_v58 }
 0x17a   : > { %v456_v43 = vrot.slane %v442_v41, %v448_v33  ;;  %v457_v44 = vcombine.high %v449_v42, %v449_v42  ;;  %v465_v45 = vrot.slane %v449_v42, %v448_v33 }
 0x17c   : > { %v479_v50 = vrot.slane %v457_v44, %v448_v33  ;;  %v472_v51 = vrot.slane %v456_v43, %v448_v33  ;;  %v458_v52 = vcombine.high %v456_v43, %v456_v43  ;;  %v487_v60 = vcombine.high %v465_v45, %v465_v45 }
 0x17d   : > { %544 = vbcast.lane.b32.xlu0 %v538_v46, 264  ;;  %511 = vbcast.lane.b32.xlu1 %v505_v47, 264  ;;  %v4312_v61 = vrot.slane %v465_v45, %v4299_v31  ;;  %v4161_v45 = vmov 1934713408  }
 0x17e   : > { %v486_v56 = vrot.slane %v458_v52, %v448_v33  ;;  %v590_v63 = vrot.slane %v487_v60, %v4299_v31  ;;  %v489_v3 = vcombine.high %v479_v50, %v479_v50  ;;  %v4317_v5 = vrot.slane %v479_v50, %v4299_v31 }
 0x17f   : > { %v488_v7 = vcombine.high %v472_v51, %v472_v51  ;;  %v598_v16 = vrot.slane %v472_v51, %v4299_v31  ;;  %v4335_v33 = vsub.s32 %v655_v25, %v4295_v26 }
 0x180   : > { %v594_v9 = vrot.slane %v489_v3, %v4299_v31  ;;  %v490_v18 = vcombine.high %v486_v56, %v486_v56  ;;  %v4327_v20 = vrot.slane %v486_v56, %v4299_v31 }
 0x181   : > { %566 = vbcast.lane.b32.xlu0 %v560_v53, 264  ;;  %533 = vbcast.lane.b32.xlu1 %v527_v54, 264  ;;  %v4322_v13 = vrot.slane %v488_v7, %v4299_v31 }
 0x182   : > { %v4331_v27 = vrot.slane %v490_v18, %v4299_v31 }
 0x185   : > { %496 = vbcast.lane.b32.xlu0 %v494_v38, 256  ;;  %555 = vbcast.lane.b32.xlu1 %v549_v57, 264 }
 0x189   : > { %518 = vbcast.lane.b32.xlu0 %v516_v37, 256  ;;  %577 = vbcast.lane.b32.xlu1 %v571_v59, 264 }
 0x18d   : > { %540 = vbcast.lane.b32.xlu0 %v538_v46, 256  ;;  %507 = vbcast.lane.b32.xlu1 %v505_v47, 256  ;;  %v718_v46 = vunpack.c.l.s4 %v4161_v45 }
 0x191   : > { %562 = vbcast.lane.b32.xlu0 %v560_v53, 256  ;;  %529 = vbcast.lane.b32.xlu1 %v527_v54, 256 }
 0x195   : > { %551 = vbcast.lane.b32.xlu1 %v549_v57, 256 }
 0x199   : > { %573 = vbcast.lane.b32.xlu1 %v571_v59, 256 }
 0x1eb   : > { %v501_v62 = vpop.permute.xlu1 %500  ;;  %v523_v0 = vpop.permute.xlu0 %522 }
 0x1ec   : > { %v620_v1 = vsub.f32 %v4312_v61, %v501_v62  ;;  %v624_v2 = vsub.f32 %v590_v63, %v523_v0  ;;  %v719_v62 = vunpack.c.0.s8 %v718_v46 }
 0x1ee   : > { %4055 = vtanh.f32 %v620_v1 }
 0x1ef   : > { %v512_v4 = vpop.permute.xlu1 %511  ;;  %v545_v6 = vpop.permute.xlu0 %544  ;;  %4057 = vtanh.f32 %v624_v2 }
 0x1f0   : > { %v622_v8 = vsub.f32 %v4317_v5, %v512_v4  ;;  %v628_v22 = vsub.f32 %v598_v16, %v545_v6 }
 0x1f2   : > { %4059 = vtanh.f32 %v622_v8  ;;  %v4346_v8 = vsub.s32 %v719_v62, %v4295_v26 }
 0x1f3   : > { %v534_v10 = vpop.permute.xlu1 %533  ;;  %v567_v11 = vpop.permute.xlu0 %566 }
 0x1f4   : > { %v626_v12 = vsub.f32 %v594_v9, %v534_v10  ;;  %v632_v17 = vsub.f32 %v4322_v13, %v567_v11 }
 0x1f6   : > { %4061 = vtanh.f32 %v626_v12 }
 0x1f7   : > { %v556_v19 = vpop.permute.xlu1 %555  ;;  %v497_v21 = vpop.permute.xlu0 %496  ;;  %4063 = vtanh.f32 %v632_v17 }
 0x1f8   : > { %v630_v23 = vsub.f32 %v4327_v20, %v556_v19  ;;  %v4056_v24 = vpop.eup %4055  ;;  %4065 = vtanh.f32 %v628_v22  ;;  %v619_v42 = vsub.f32 %v4312_v61, %v497_v21 }
 0x1f9   : > { %v4058_v28 = vpop.eup %4057 }
 0x1fa   : > { %4067 = vtanh.f32 %v630_v23  ;;  %v787_v34 = vcombine.low %v4056_v24, %v4058_v28  ;;  %v788_v35 = vcombine.high %v4056_v24, %v4058_v28 }
 0x1fb   : > { %v578_v29 = vpop.permute.xlu1 %577  ;;  %v519_v30 = vpop.permute.xlu0 %518 }
 0x1fc   : > { %v634_v32 = vsub.f32 %v4331_v27, %v578_v29  ;;  %v4060_v36 = vpop.eup %4059  ;;  %v623_v37 = vsub.f32 %v590_v63, %v519_v30  ;;  %v795_v47 = vrot.slane %v787_v34, %v4335_v33  ;;  %v802_v48 = vrot.slane %v788_v35, %v4335_v33 }
 0x1fe   : > { %4069 = vtanh.f32 %v634_v32 }
 0x1ff   : > { %v508_v38 = vpop.permute.xlu1 %507  ;;  %v541_v39 = vpop.permute.xlu0 %540  ;;  %4071 = vtanh.f32 %v623_v37 }
 0x200   : > { %v4062_v41 = vpop.eup %4061  ;;  %v621_v49 = vsub.f32 %v4317_v5, %v508_v38  ;;  %4073 = vtanh.f32 %v619_v42  ;;  %v627_v55 = vsub.f32 %v598_v16, %v541_v39 }
 0x201   : > { %v803_v43 = vcombine.low %v4060_v36, %v4062_v41  ;;  %v804_v44 = vcombine.high %v4060_v36, %v4062_v41  ;;  %v4064_v54 = vpop.eup %4063 }
 0x202   : > { %v4066_v61 = vpop.eup %4065 }
 0x203   : > { %v530_v50 = vpop.permute.xlu1 %529  ;;  %v563_v51 = vpop.permute.xlu0 %562  ;;  %v811_v52 = vrot.slane %v803_v43, %v4335_v33  ;;  %v818_v53 = vrot.slane %v804_v44, %v4335_v33  ;;  %v819_v2 = vcombine.low %v4066_v61, %v4064_v54  ;;  %v820_v3 = vcombine.high %v4066_v61, %v4064_v54 }
 0x204   : > { %v625_v56 = vsub.f32 %v594_v9, %v530_v50  ;;  %v631_v63 = vsub.f32 %v4322_v13, %v563_v51  ;;  %v4068_v0 = vpop.eup %4067 }
 0x205   : > { %v851_v57 = vcombine.low %v795_v47, %v811_v52  ;;  %v852_v58 = vcombine.high %v795_v47, %v811_v52  ;;  %v867_v59 = vcombine.low %v802_v48, %v818_v53  ;;  %v868_v60 = vcombine.high %v802_v48, %v818_v53 }
 0x206   : > { %4075 = vtanh.f32 %v625_v56  ;;  %v827_v10 = vrot.slane %v819_v2, %v4335_v33  ;;  %v834_v12 = vrot.slane %v820_v3, %v4335_v33 }
 0x207   : > { %4077 = vtanh.f32 %v621_v49  ;;  %v552_v1 = vpop.permute.xlu1 %551  ;;  %v4354_v21 = vrot.slane %v851_v57, %v4346_v8  ;;  %v866_v22 = vrot.slane %v852_v58, %v4346_v8  ;;  %v4358_v23 = vrot.slane %v867_v59, %v4346_v8 }
 0x208   : > { %v4070_v4 = vpop.eup %4069  ;;  %v629_v5 = vsub.f32 %v4327_v20, %v552_v1  ;;  %4079 = vtanh.f32 %v627_v55  ;;  %v882_v32 = vrot.slane %v868_v60, %v4346_v8 }
 0x209   : > { %v835_v6 = vcombine.low %v4068_v0, %v4070_v4  ;;  %v836_v7 = vcombine.high %v4068_v0, %v4070_v4  ;;  %4081 = vtanh.f32 %v631_v63  ;;  %v4072_v15 = vpop.eup %4071 }
 0x20a   : > { %4083 = vtanh.f32 %v629_v5  ;;  %v4074_v20 = vpop.eup %4073 }
 0x20b   : > { %v574_v9 = vpop.permute.xlu1 %573  ;;  %v843_v11 = vrot.slane %v835_v6, %v4335_v33  ;;  %v850_v13 = vrot.slane %v836_v7, %v4335_v33  ;;  %v651_v30 = vcombine.low %v4074_v20, %v4072_v15  ;;  %v652_v34 = vcombine.high %v4074_v20, %v4072_v15 }
 0x20c   : > { %v633_v14 = vsub.f32 %v4331_v27, %v574_v9 }
 0x20d   : > { %v883_v16 = vcombine.low %v827_v10, %v843_v11  ;;  %v884_v17 = vcombine.high %v827_v10, %v843_v11  ;;  %v899_v18 = vcombine.low %v834_v12, %v850_v13  ;;  %v900_v19 = vcombine.high %v834_v12, %v850_v13 }
 0x20e   : > { %4085 = vtanh.f32 %v633_v14  ;;  %v659_v49 = vrot.slane %v651_v30, %v4335_v33  ;;  %v666_v51 = vrot.slane %v652_v34, %v4335_v33  ;;  %v3837_v30 = vpop.f32.mrb[2].mxu0  ;;  %v309_v34 = vld [vmem:[%s5069_s4] sm:$0xff] }
 0x20f   : > { %v4361_v24 = vrot.slane %v883_v16, %v4346_v8  ;;  %v898_v25 = vrot.slane %v884_v17, %v4346_v8  ;;  %v907_v27 = vrot.slane %v899_v18, %v4346_v8  ;;  %v4366_v28 = vrot.slane %v900_v19, %v4346_v8 }
 0x210   : > { %v4076_v29 = vpop.eup %4075 }
 0x211   : > { %v4078_v35 = vpop.eup %4077  ;;  %v916_v36 = vcombine.high %v4354_v21, %v4361_v24  ;;  %v917_v37 = vcombine.low %v866_v22, %v898_v25  ;;  %v918_v38 = vcombine.high %v866_v22, %v898_v25  ;;  %v919_v39 = vcombine.low %v4358_v23, %v907_v27 }
 0x212   : > { %v920_v41 = vcombine.high %v4358_v23, %v907_v27  ;;  %v667_v42 = vcombine.low %v4078_v35, %v4076_v29  ;;  %v921_v43 = vcombine.low %v882_v32, %v4366_v28  ;;  %v4080_v44 = vpop.eup %4079  ;;  %v922_v45 = vcombine.high %v882_v32, %v4366_v28  ;;  %v311_v27 = vld [vmem:[%s5071_s6] sm:$0xff]  ;;  %v312_v28 = vld [vmem:[%s5071_s6 + $0x8] sm:$0xff]  ;;  %v1193_v32 = vpop.f32.mrb[3].mxu0 }
 0x213   : > { %952 = vrot.lane.b32.xlu0 %v916_v36, %s4158_s19  ;;  %v668_v46 = vcombine.high %v4078_v35, %v4076_v29  ;;  %v915_v47 = vcombine.low %v4354_v21, %v4361_v24  ;;  %v4082_v48 = vpop.eup %4081  ;;  %v4162_v29 = vmov 0.0   ;;  %v310_v35 = vld [vmem:[%s5069_s4 + $0x8] sm:$0xff] }
 0x214   : > { %v675_v50 = vrot.slane %v667_v42, %v4335_v33  ;;  %v4084_v53 = vpop.eup %4083  ;;  %v683_v56 = vcombine.low %v4080_v44, %v4082_v48  ;;  %v684_v57 = vcombine.high %v4080_v44, %v4082_v48  ;;  %1081 = vmatprep.mubr.f32.mxu1 %v4162_v29  ;;  %3842 = vmatprep.mubr.msk.f32.mxu0 %vm4164_vm10, %v4162_v29 }
 0x215   : > { %v682_v52 = vrot.slane %v668_v46, %v4335_v33 }
 0x216   : > { %v715_v54 = vcombine.low %v659_v49, %v675_v50  ;;  %v716_v55 = vcombine.high %v659_v49, %v675_v50  ;;  %v691_v63 = vrot.slane %v683_v56, %v4335_v33  ;;  %v698_v1 = vrot.slane %v684_v57, %v4335_v33 }
 0x217   : > { %956 = vrot.lane.b32.xlu0 %v917_v37, %s4156_s13  ;;  %v731_v58 = vcombine.low %v666_v51, %v682_v52  ;;  %v732_v59 = vcombine.high %v666_v51, %v682_v52 }
 0x218   : > { %v4086_v60 = vpop.eup %4085  ;;  %v4389_v7 = vrot.slane %v715_v54, %v4346_v8  ;;  %v730_v9 = vrot.slane %v716_v55, %v4346_v8 }
 0x219   : > { %v699_v61 = vcombine.low %v4084_v53, %v4086_v60  ;;  %v700_v62 = vcombine.high %v4084_v53, %v4086_v60  ;;  %v739_v10 = vrot.slane %v731_v58, %v4346_v8  ;;  %v746_v15 = vrot.slane %v732_v59, %v4346_v8 }
 0x21b   : > { %960 = vrot.lane.b32.xlu0 %v918_v38, %s4155_s12  ;;  %v707_v0 = vrot.slane %v699_v61, %v4335_v33  ;;  %v714_v2 = vrot.slane %v700_v62, %v4335_v33  ;;  %v305_v62 = vld [vmem:[%s5070_s5] sm:$0xff] }
 0x21d   : > { %v747_v3 = vcombine.low %v691_v63, %v707_v0  ;;  %v748_v4 = vcombine.high %v691_v63, %v707_v0  ;;  %v763_v5 = vcombine.low %v698_v1, %v714_v2  ;;  %v764_v6 = vcombine.high %v698_v1, %v714_v2  ;;  %v306_v0 = vld [vmem:[%s5070_s5 + $0x8] sm:$0xff] }
 0x21f   : > { %964 = vrot.lane.b32.xlu0 %v919_v39, %s4154_s25  ;;  %v4395_v11 = vrot.slane %v747_v3, %v4346_v8  ;;  %v762_v12 = vrot.slane %v748_v4, %v4346_v8  ;;  %v771_v13 = vrot.slane %v763_v5, %v4346_v8  ;;  %v778_v14 = vrot.slane %v764_v6, %v4346_v8  ;;  %v313_v5 = vld [vmem:[%s5072_s7] sm:$0x3] }
 0x220   : > { %v1098_v6 = vrot.slane %v313_v5, %v4299_v31 }
 0x221   : > { %v780_v16 = vcombine.high %v4389_v7, %v4395_v11  ;;  %v781_v17 = vcombine.low %v730_v9, %v762_v12  ;;  %v782_v18 = vcombine.high %v730_v9, %v762_v12  ;;  %v783_v19 = vcombine.low %v739_v10, %v771_v13 }
 0x222   : > { %v784_v20 = vcombine.high %v739_v10, %v771_v13  ;;  %v785_v22 = vcombine.low %v746_v15, %v778_v14  ;;  %v786_v23 = vcombine.high %v746_v15, %v778_v14  ;;  %v779_v25 = vcombine.low %v4389_v7, %v4395_v11 }
 0x223   : > { %968 = vrot.lane.b32.xlu0 %v920_v41, %s4152_s23  ;;  %924 = vrot.lane.b32.xlu1 %v780_v16, %s4158_s19  ;;  %v1102_v15 = vrot.slane %v313_v5, %v504_v40 }
 0x227   : > { %972 = vrot.lane.b32.xlu0 %v921_v43, %s4153_s24  ;;  %928 = vrot.lane.b32.xlu1 %v781_v17, %s4156_s13  ;;  %v4163_v17 = vmov 0.0|0.0  }
 0x228   : > { %3950 = vmatprep.subr.bf16.mxu0 %v4163_v17 }
 0x22b   : > { %976 = vrot.lane.b32.xlu0 %v922_v45, %s4151_s22  ;;  %932 = vrot.lane.b32.xlu1 %v782_v18, %s4155_s12 }
 0x22f   : > { %1002 = vperm.xlu0 %4054, %v311_v27   ;;  %936 = vrot.lane.b32.xlu1 %v783_v19, %s4154_s25 }
 0x233   : > { %1007 = vperm.xlu0 %4054, %v312_v28   ;;  %940 = vrot.lane.b32.xlu1 %v784_v20, %s4152_s23 }
 0x237   : > { %944 = vrot.lane.b32.xlu1 %v785_v22, %s4153_s24 }
 0x23b   : > { %948 = vrot.lane.b32.xlu1 %v786_v23, %s4151_s22 }
 0x23f   : > { %1111 = vperm.xlu1 %4053, %v309_v34  }
 0x243   : > { %1116 = vperm.xlu1 %4053, %v310_v35  }
 0x285   : > { %v953_v36 = vpop.permute.xlu0 %952 }
 0x286   : > { %v993_v43 = vsel %vm979_vm2, %v915_v47, %v953_v36 }
 0x289   : > { %v957_v37 = vpop.permute.xlu0 %956 }
 0x28a   : > { %v994_v44 = vsel %vm981_vm3, %v993_v43, %v957_v37 }
 0x28d   : > { %v961_v38 = vpop.permute.xlu0 %960 }
 0x28e   : > { %v995_v48 = vsel %vm983_vm4, %v994_v44, %v961_v38 }
 0x291   : > { %v965_v39 = vpop.permute.xlu0 %964 }
 0x292   : > { %v996_v49 = vsel %vm985_vm5, %v995_v48, %v965_v39 }
 0x295   : > { %v925_v41 = vpop.permute.xlu1 %924  ;;  %v969_v42 = vpop.permute.xlu0 %968 }
 0x296   : > { %v997_v50 = vsel %vm987_vm6, %v996_v49, %v969_v42  ;;  %v980_v54 = vsel %vm979_vm2, %v779_v25, %v925_v41 }
 0x299   : > { %v929_v45 = vpop.permute.xlu1 %928  ;;  %v973_v46 = vpop.permute.xlu0 %972 }
 0x29a   : > { %v998_v51 = vsel %vm989_vm7, %v997_v50, %v973_v46  ;;  %v982_v55 = vsel %vm981_vm3, %v980_v54, %v929_v45 }
 0x29d   : > { %v933_v52 = vpop.permute.xlu1 %932  ;;  %v977_v21 = vpop.permute.xlu0 %976 }
 0x29e   : > { %v999_v24 = vsel %vm991_vm8, %v998_v51, %v977_v21  ;;  %v984_v57 = vsel %vm983_vm4, %v982_v55, %v933_v52 }
 0x29f   : > { %1017 = vmatprep.subr.mxu1 %v999_v24 }
 0x2a1   : > { %v937_v47 = vpop.permute.xlu1 %936 }
 0x2a2   : > { %v986_v58 = vsel %vm985_vm5, %v984_v57, %v937_v47 }
 0x2a5   : > { %v941_v53 = vpop.permute.xlu1 %940 }
 0x2a6   : > { %v988_v59 = vsel %vm987_vm6, %v986_v58, %v941_v53 }
 0x2a9   : > { %v945_v56 = vpop.permute.xlu1 %944 }
 0x2aa   : > { %v990_v60 = vsel %vm989_vm7, %v988_v59, %v945_v56 }
 0x2ad   : > { %v949_v61 = vpop.permute.xlu1 %948 }
 0x2ae   : > { %v992_v63 = vsel %vm991_vm8, %v990_v60, %v949_v61  ;;  %v1003_v7 = vpop.permute.xlu0 %1002 }
 0x2af   : > { %1018 = vmatpush1.msra.mxu1 %v992_v63 }
 0x2b0   : > { %3747 = vmatmul.mubr.msk.f32.vlgmr.msra.gmra.mrb[0].mxu1 %vm1010_vm9, %v305_v62  ;;  %3953 = vmatprep.subr.bf16.mxu1 %v4163_v17 }
 0x2b1   : > { %1087 = vmatprep.mubr.f32.mxu1 %v4162_v29 }
 0x2b2   : > { %v1008_v26 = vpop.permute.xlu0 %1007 }
 0x2b4   : > { %3748 = vmatmul.mubr.msk.f32.gmra.mrb[2].mxu1 %vm1010_vm9, %v306_v0 }
 0x2b5   : > { %3849 = vmatprep.mubr.msk.f32.mxu1 %vm4164_vm10, %v4162_v29 }
 0x2be   : > { %v1112_v1 = vpop.permute.xlu1 %1111 }
 0x2bf   : > { %v4452_v2 = vadd.f32 %v1193_v32, %v1112_v1 }
 0x2c1   : > { %1210 = vrot.lane.b32.xlu1 %v4452_v2, %s4153_s24  ;;  %1204 = vrot.lane.b32.xlu0 %v4452_v2, %s4151_s22 }
 0x2c2   : > { %v1117_v3 = vpop.permute.xlu1 %1116 }
 0x2c3   : > { %v4466_v4 = vadd.f32 %v3837_v30, %v1117_v3 }
 0x2c5   : > { %1222 = vrot.lane.b32.xlu1 %v4452_v2, %s4154_s25  ;;  %1216 = vrot.lane.b32.xlu0 %v4452_v2, %s4152_s23 }
 0x2c9   : > { %1234 = vrot.lane.b32.xlu1 %v4452_v2, %s4156_s13  ;;  %1228 = vrot.lane.b32.xlu0 %v4452_v2, %s4155_s12 }
 0x2cd   : > { %1240 = vrot.lane.b32.xlu0 %v4452_v2, %s4158_s19  ;;  %1206 = vrot.lane.b32.xlu1 %v4466_v4, %s4151_s22 }
 0x2d1   : > { %1212 = vrot.lane.b32.xlu0 %v4466_v4, %s4153_s24  ;;  %1218 = vrot.lane.b32.xlu1 %v4466_v4, %s4152_s23 }
 0x333   : > { %v1211_v22 = vpop.permute.xlu1 %1210  ;;  %v1205_v23 = vpop.permute.xlu0 %1204 }
 0x334   : > { %v1246_v43 = vcombine.low %v4452_v2, %v1211_v22  ;;  %v1247_v50 = vcombine.high %v4452_v2, %v1211_v22 }
 0x336   : > { %v1254_v21 = vrot.slane %v1246_v43, %v4335_v33  ;;  %v1261_v57 = vrot.slane %v1247_v50, %v4335_v33 }
 0x337   : > { %v1223_v25 = vpop.permute.xlu1 %1222  ;;  %v1217_v27 = vpop.permute.xlu0 %1216 }
 0x338   : > { %v1262_v39 = vcombine.low %v1205_v23, %v1217_v27  ;;  %v1263_v45 = vcombine.high %v1205_v23, %v1217_v27 }
 0x33a   : > { %v1270_v46 = vrot.slane %v1262_v39, %v4335_v33  ;;  %v1277_v53 = vrot.slane %v1263_v45, %v4335_v33 }
 0x33b   : > { %v1235_v28 = vpop.permute.xlu1 %1234  ;;  %v1229_v30 = vpop.permute.xlu0 %1228 }
 0x33c   : > { %v1278_v48 = vcombine.low %v1223_v25, %v1235_v28  ;;  %v1279_v24 = vcombine.high %v1223_v25, %v1235_v28  ;;  %v1310_v54 = vcombine.low %v1254_v21, %v1270_v46  ;;  %v1311_v58 = vcombine.high %v1254_v21, %v1270_v46 }
 0x33d   : > { %v1326_v63 = vcombine.low %v1261_v57, %v1277_v53  ;;  %v1327_v2 = vcombine.high %v1261_v57, %v1277_v53 }
 0x33e   : > { %v1286_v55 = vrot.slane %v1278_v48, %v4335_v33  ;;  %v1293_v61 = vrot.slane %v1279_v24, %v4335_v33  ;;  %v4585_v1 = vrot.slane %v1310_v54, %v4346_v8  ;;  %v4588_v5 = vrot.slane %v1311_v58, %v4346_v8 }
 0x33f   : > { %v1207_v32 = vpop.permute.xlu1 %1206  ;;  %v1241_v34 = vpop.permute.xlu0 %1240  ;;  %v4611_v23 = vrot.slane %v1327_v2, %v4346_v8 }
 0x340   : > { %v1294_v44 = vcombine.low %v1229_v30, %v1241_v34  ;;  %v1295_v49 = vcombine.high %v1229_v30, %v1241_v34 }
 0x342   : > { %v1302_v47 = vrot.slane %v1294_v44, %v4335_v33  ;;  %v1309_v56 = vrot.slane %v1295_v49, %v4335_v33 }
 0x343   : > { %v1219_v35 = vpop.permute.xlu1 %1218  ;;  %v1213_v36 = vpop.permute.xlu0 %1212 }
 0x344   : > { %v1342_v62 = vcombine.low %v1286_v55, %v1302_v47  ;;  %v1343_v0 = vcombine.high %v1286_v55, %v1302_v47  ;;  %v1358_v3 = vcombine.low %v1293_v61, %v1309_v56 }
 0x346   : > { %v4614_v25 = vrot.slane %v1358_v3, %v4346_v8 }
 0x383   : > { %v1083_v9 = vpop.f32.mrb[0].mxu1 }
 0x384   : > { %v1084_v10 = vadd.f32 %v1083_v9, %v1003_v7  ;;  %v1085_v11 = vpop.f32.mrb[1].mxu1 }
 0x385   : > { %v1086_v31 = vadd.f32 %v1085_v11, %v1003_v7  ;;  %v1398_v7 = vcombine.low %v1207_v32, %v1219_v35 }
 0x386   : > { %v4480_v12 = vadd.f32 %v1098_v6, %v1084_v10 }
 0x387   : > { %v1089_v13 = vpop.f32.mrb[2].mxu1  ;;  %v4496_v16 = vadd.f32 %v1102_v15, %v1086_v31  ;;  %v1382_v31 = vcombine.low %v4466_v4, %v1213_v36  ;;  %v4624_v30 = vrot.slane %v1398_v7, %v4335_v33 }
 0x388   : > { %v1091_v14 = vpop.f32.mrb[3].mxu1  ;;  %1526 = vrot.lane.b32.xlu1 %v4480_v12, %s4153_s24  ;;  %1520 = vrot.lane.b32.xlu0 %v4480_v12, %s4151_s22  ;;  %v1090_v40 = vadd.f32 %v1089_v13, %v1008_v26  ;;  %v4596_v13 = vrot.slane %v1342_v62, %v4346_v8 }
 0x389   : > { %v1092_v19 = vadd.f32 %v1091_v14, %v1008_v26  ;;  %v1399_v14 = vcombine.high %v1207_v32, %v1219_v35  ;;  %v4601_v26 = vrot.slane %v1326_v63, %v4346_v8  ;;  %v4635_v44 = vrot.slane %v1382_v31, %v4335_v33 }
 0x38a   : > { %v4516_v18 = vadd.f32 %v1098_v6, %v1090_v40  ;;  %v1359_v6 = vcombine.high %v1293_v61, %v1309_v56  ;;  %v4604_v40 = vrot.slane %v1343_v0, %v4346_v8  ;;  %v1374_v39 = vcombine.low %v4585_v1, %v4596_v13 }
 0x38b   : > { %v4534_v20 = vadd.f32 %v1102_v15, %v1092_v19  ;;  %v1383_v15 = vcombine.high %v4466_v4, %v1213_v36  ;;  %v4632_v43 = vrot.slane %v1399_v14, %v4335_v33  ;;  %v1375_v46 = vcombine.high %v4585_v1, %v4596_v13 }
 0x38c   : > { %1538 = vrot.lane.b32.xlu1 %v4480_v12, %s4154_s25  ;;  %1532 = vrot.lane.b32.xlu0 %v4480_v12, %s4152_s23  ;;  %v4621_v28 = vrot.slane %v1359_v6, %v4346_v8  ;;  %v1376_v48 = vcombine.low %v4588_v5, %v4604_v40  ;;  %v1377_v21 = vcombine.high %v4588_v5, %v4604_v40 }
 0x38d   : > { %v4638_v45 = vrot.slane %v1383_v15, %v4335_v33 }
 0x390   : > { %1550 = vrot.lane.b32.xlu1 %v4480_v12, %s4156_s13  ;;  %1544 = vrot.lane.b32.xlu0 %v4480_v12, %s4155_s12 }
 0x394   : > { %1564 = vrot.lane.b32.xlu1 %v4496_v16, %s4151_s22  ;;  %1556 = vrot.lane.b32.xlu0 %v4480_v12, %s4158_s19 }
 0x398   : > { %1576 = vrot.lane.b32.xlu1 %v4496_v16, %s4152_s23  ;;  %1570 = vrot.lane.b32.xlu0 %v4496_v16, %s4153_s24 }
 0x39c   : > { %1588 = vrot.lane.b32.xlu1 %v4496_v16, %s4155_s12  ;;  %1582 = vrot.lane.b32.xlu0 %v4496_v16, %s4154_s25 }
 0x3a0   : > { %1600 = vrot.lane.b32.xlu1 %v4496_v16, %s4158_s19  ;;  %1594 = vrot.lane.b32.xlu0 %v4496_v16, %s4156_s13 }
 0x3a4   : > { %1528 = vrot.lane.b32.xlu0 %v4516_v18, %s4153_s24  ;;  %1522 = vrot.lane.b32.xlu1 %v4516_v18, %s4151_s22 }
 0x3a8   : > { %1540 = vrot.lane.b32.xlu0 %v4516_v18, %s4154_s25  ;;  %1534 = vrot.lane.b32.xlu1 %v4516_v18, %s4152_s23 }
 0x3ac   : > { %1552 = vrot.lane.b32.xlu0 %v4516_v18, %s4156_s13  ;;  %1546 = vrot.lane.b32.xlu1 %v4516_v18, %s4155_s12 }
 0x3b0   : > { %1566 = vrot.lane.b32.xlu0 %v4534_v20, %s4151_s22  ;;  %1558 = vrot.lane.b32.xlu1 %v4516_v18, %s4158_s19 }
 0x3b4   : > { %1578 = vrot.lane.b32.xlu0 %v4534_v20, %s4152_s23  ;;  %1572 = vrot.lane.b32.xlu1 %v4534_v20, %s4153_s24 }
 0x3b8   : > { %1590 = vrot.lane.b32.xlu0 %v4534_v20, %s4155_s12  ;;  %1584 = vrot.lane.b32.xlu1 %v4534_v20, %s4154_s25 }
 0x3bc   : > { %1602 = vrot.lane.b32.xlu0 %v4534_v20, %s4158_s19  ;;  %1596 = vrot.lane.b32.xlu1 %v4534_v20, %s4156_s13 }
 0x3c0   : > { %1224 = vrot.lane.b32.xlu0 %v4466_v4, %s4154_s25  ;;  %1230 = vrot.lane.b32.xlu1 %v4466_v4, %s4155_s12 }
 0x3c4   : > { %1236 = vrot.lane.b32.xlu0 %v4466_v4, %s4156_s13  ;;  %1242 = vrot.lane.b32.xlu1 %v4466_v4, %s4158_s19 }
 0x3fa   : > { %v4560_v37 = vpop.permute.xlu1 %1526  ;;  %v4562_v38 = vpop.permute.xlu0 %1520 }
 0x3fb   : > { %v1606_v32 = vcombine.low %v4480_v12, %v4560_v37  ;;  %v1607_v54 = vcombine.high %v4480_v12, %v4560_v37 }
 0x3fd   : > { %v1614_v55 = vrot.slane %v1606_v32, %v4335_v33 }
 0x3fe   : > { %v4564_v41 = vpop.permute.xlu1 %1538  ;;  %v4566_v42 = vpop.permute.xlu0 %1532 }
 0x3ff   : > { %v1622_v19 = vcombine.low %v4562_v38, %v4566_v42  ;;  %v1623_v56 = vcombine.high %v4562_v38, %v4566_v42 }
 0x401   : > { %v1630_v49 = vrot.slane %v1622_v19, %v4335_v33 }
 0x402   : > { %v4571_v51 = vpop.permute.xlu1 %1550  ;;  %v4573_v52 = vpop.permute.xlu0 %1544 }
 0x403   : > { %v1638_v22 = vcombine.low %v4564_v41, %v4571_v51 }
 0x405   : > { %v1646_v50 = vrot.slane %v1638_v22, %v4335_v33 }
 0x406   : > { %v4581_v59 = vpop.permute.xlu1 %1564  ;;  %v1557_v60 = vpop.permute.xlu0 %1556 }
 0x407   : > { %v1654_v9 = vcombine.low %v4573_v52, %v1557_v60  ;;  %v1655_v24 = vcombine.high %v4573_v52, %v1557_v60  ;;  %v1670_v52 = vcombine.low %v1614_v55, %v1630_v49  ;;  %v1639_v60 = vcombine.high %v4564_v41, %v4571_v51 }
 0x409   : > { %v1662_v34 = vrot.slane %v1654_v9, %v4335_v33  ;;  %v4663_v37 = vrot.slane %v1655_v24, %v4335_v33  ;;  %v1678_v15 = vrot.slane %v1670_v52, %v4346_v8  ;;  %v1653_v19 = vrot.slane %v1639_v60, %v4335_v33 }
 0x40a   : > { %v4591_v10 = vpop.permute.xlu1 %1576  ;;  %v4593_v11 = vpop.permute.xlu0 %1570 }
 0x40b   : > { %v1758_v4 = vcombine.low %v4581_v59, %v4591_v10  ;;  %v1742_v27 = vcombine.low %v4496_v16, %v4593_v11  ;;  %v1702_v57 = vcombine.low %v1646_v50, %v1662_v34  ;;  %v1759_v3 = vcombine.high %v4581_v59, %v4591_v10 }
 0x40c   : > { %v1743_v12 = vcombine.high %v4496_v16, %v4593_v11  ;;  %v1703_v7 = vcombine.high %v1646_v50, %v1662_v34  ;;  %v4679_v59 = vrot.slane %v1623_v56, %v4335_v33  ;;  %v1718_v50 = vcombine.low %v1653_v19, %v4663_v37 }
 0x40d   : > { %v1766_v47 = vrot.slane %v1758_v4, %v4335_v33  ;;  %v1750_v53 = vrot.slane %v1742_v27, %v4335_v33  ;;  %v1710_v9 = vrot.slane %v1702_v57, %v4346_v8  ;;  %v4684_v22 = vrot.slane %v1759_v3, %v4335_v33 }
 0x40e   : > { %v1589_v35 = vpop.permute.xlu1 %1588  ;;  %v1583_v36 = vpop.permute.xlu0 %1582  ;;  %v4687_v4 = vrot.slane %v1743_v12, %v4335_v33  ;;  %v1671_v27 = vcombine.high %v1614_v55, %v1630_v49  ;;  %v1380_v12 = vcombine.low %v4611_v23, %v4621_v28 }
 0x40f   : > { %v1806_v38 = vcombine.low %v1750_v53, %v1766_v47  ;;  %v1807_v10 = vcombine.high %v1750_v53, %v1766_v47  ;;  %v1734_v56 = vcombine.low %v1678_v15, %v1710_v9  ;;  %v1735_v57 = vcombine.high %v1678_v15, %v1710_v9 }
 0x410   : > { %v1381_v9 = vcombine.high %v4611_v23, %v4621_v28 }
 0x411   : > { %v1814_v32 = vrot.slane %v1806_v38, %v4346_v8  ;;  %v1821_v49 = vrot.slane %v1807_v10, %v4346_v8  ;;  %v1719_v10 = vcombine.high %v1653_v19, %v4663_v37 }
 0x412   : > { %v1601_v58 = vpop.permute.xlu1 %1600  ;;  %v1595_v61 = vpop.permute.xlu0 %1594 }
 0x413   : > { %v1790_v62 = vcombine.low %v1589_v35, %v1601_v58  ;;  %v1791_v63 = vcombine.high %v1589_v35, %v1601_v58  ;;  %v1774_v0 = vcombine.low %v1583_v36, %v1595_v61  ;;  %v1775_v2 = vcombine.high %v1583_v36, %v1595_v61 }
 0x414   : > { %v1717_v36 = vrot.slane %v1703_v7, %v4346_v8  ;;  %v1378_v61 = vcombine.low %v4601_v26, %v4614_v25 }
 0x415   : > { %v1798_v42 = vrot.slane %v1790_v62, %v4335_v33  ;;  %v1782_v6 = vrot.slane %v1774_v0, %v4335_v33  ;;  %v4669_v14 = vrot.slane %v1791_v63, %v4335_v33  ;;  %v4672_v41 = vrot.slane %v1775_v2, %v4335_v33 }
 0x416   : > { %v4674_v51 = vpop.permute.xlu1 %1522  ;;  %v4676_v16 = vpop.permute.xlu0 %1528  ;;  %v1379_v62 = vcombine.high %v4601_v26, %v4614_v25  ;;  %v1621_v63 = vrot.slane %v1607_v54, %v4335_v33  ;;  %v1822_v0 = vcombine.low %v4687_v4, %v4684_v22  ;;  %v1685_v2 = vrot.slane %v1671_v27, %v4346_v8 }
 0x417   : > { %v1838_v11 = vcombine.low %v1782_v6, %v1798_v42  ;;  %v1839_v31 = vcombine.high %v1782_v6, %v1798_v42  ;;  %v1854_v24 = vcombine.low %v4672_v41, %v4669_v14  ;;  %v1855_v27 = vcombine.high %v4672_v41, %v4669_v14 }
 0x418   : > { %v1686_v38 = vcombine.low %v1621_v63, %v4679_v59  ;;  %v1830_v15 = vrot.slane %v1822_v0, %v4346_v8  ;;  %v1687_v37 = vcombine.high %v1621_v63, %v4679_v59  ;;  %v1823_v14 = vcombine.high %v4687_v4, %v4684_v22 }
 0x419   : > { %v1846_v34 = vrot.slane %v1838_v11, %v4346_v8  ;;  %v1853_v35 = vrot.slane %v1839_v31, %v4346_v8  ;;  %v1862_v42 = vrot.slane %v1854_v24, %v4346_v8  ;;  %v1726_v11 = vrot.slane %v1718_v50, %v4346_v8 }
 0x41a   : > { %v4696_v47 = vpop.permute.xlu1 %1534  ;;  %v4698_v53 = vpop.permute.xlu0 %1540  ;;  %v1736_v31 = vcombine.low %v1685_v2, %v1717_v36  ;;  %v1694_v50 = vrot.slane %v1686_v38, %v4346_v8  ;;  %v1733_v59 = vrot.slane %v1719_v10, %v4346_v8  ;;  %v1869_v4 = vrot.slane %v1855_v27, %v4346_v8 }
 0x41b   : > { %v1870_v55 = vcombine.low %v1814_v32, %v1846_v34  ;;  %v1871_v58 = vcombine.high %v1814_v32, %v1846_v34  ;;  %v1872_v3 = vcombine.low %v1821_v49, %v1853_v35  ;;  %v1873_v54 = vcombine.high %v1821_v49, %v1853_v35 }
 0x41c   : > { %v1737_v32 = vcombine.high %v1685_v2, %v1717_v36  ;;  %v1446_v34 = vcombine.low %v4635_v44, %v4624_v30  ;;  %v1447_v35 = vcombine.high %v4635_v44, %v4624_v30  ;;  %v1874_v44 = vcombine.low %v1830_v15, %v1862_v42 }
 0x41d   : > { %v3951_v52 = vpack.c.bf16 %v1870_v55, %v1734_v56  ;;  %v3954_v60 = vpack.c.bf16 %v1871_v58, %v1735_v57  ;;  %v3957_v19 = vpack.c.bf16 %v1872_v3, %v1736_v31  ;;  %v1894_v24 = vcombine.low %v4674_v51, %v4696_v47 }
 0x41e   : > { %v4713_v6 = vpop.permute.xlu1 %1546  ;;  %v4715_v7 = vpop.permute.xlu0 %1552  ;;  %v3960_v30 = vpack.c.bf16 %v1873_v54, %v1737_v32  ;;  %v1875_v22 = vcombine.high %v1830_v15, %v1862_v42  ;;  %v1738_v56 = vcombine.low %v1694_v50, %v1726_v11  ;;  %v1878_v49 = vcombine.low %v4516_v18, %v4676_v16 }
 0x41f   : > { %3952 = vmatpush3.bf16.msra.mxu0 %v3951_v52  ;;  %3955 = vmatpush3.bf16.msra.mxu1 %v3954_v60  ;;  %v1879_v1 = vcombine.high %v4516_v18, %v4676_v16  ;;  %v1739_v13 = vcombine.high %v1694_v50, %v1726_v11  ;;  %v1462_v55 = vcombine.low %v4638_v45, %v4632_v43 }
 0x420   : > { %3956 = vmatprep.subr.bf16.mxu0 %v4163_v17  ;;  %3959 = vmatprep.subr.bf16.mxu1 %v4163_v17  ;;  %v3963_v16 = vpack.c.bf16 %v1874_v44, %v1738_v56  ;;  %v1701_v57 = vrot.slane %v1687_v37, %v4346_v8  ;;  %v4777_v58 = vrot.slane %v1894_v24, %v4335_v33 }
 0x421   : > { %v3966_v63 = vpack.c.bf16 %v1875_v22, %v1739_v13  ;;  %v1910_v2 = vcombine.low %v4698_v53, %v4715_v7  ;;  %v1886_v60 = vrot.slane %v1878_v49, %v4335_v33  ;;  %v4793_v3 = vrot.slane %v1879_v1, %v4335_v33 }
 0x422   : > { %v4734_v41 = vpop.permute.xlu1 %1558  ;;  %3843 = vmatmul.mubr.msk.f32.vlgmr.msra.gmra.mrb[4].mxu0 %vm979_vm2, %v1374_v39  ;;  %v4740_v36 = vpop.permute.xlu0 %1566  ;;  %3850 = vmatmul.mubr.msk.f32.vlgmr.msra.gmra.mrb[4].mxu1 %vm979_vm2, %v1375_v46  ;;  %v1895_v39 = vcombine.high %v4674_v51, %v4696_v47  ;;  %v1837_v46 = vrot.slane %v1823_v14, %v4346_v8  ;;  %v1740_v5 = vcombine.low %v1701_v57, %v1733_v59 }
 0x423   : > { %3958 = vmatpush3.bf16.msra.mxu0 %v3957_v19  ;;  %3961 = vmatpush3.bf16.msra.mxu1 %v3960_v30  ;;  %v1926_v51 = vcombine.low %v4713_v6, %v4734_v41  ;;  %v4805_v31 = vrot.slane %v1447_v35, %v4346_v8  ;;  %v1942_v15 = vcombine.low %v1886_v60, %v4777_v58 }
 0x424   : > { %3856 = vmatprep.mubr.msk.f32.mxu0 %vm4164_vm10, %v4162_v29  ;;  %3863 = vmatprep.mubr.msk.f32.mxu1 %vm4164_vm10, %v4162_v29  ;;  %v4787_v0 = vrot.slane %v1895_v39, %v4335_v33  ;;  %v1876_v52 = vcombine.low %v1837_v46, %v1869_v4  ;;  %v1877_v40 = vcombine.high %v1837_v46, %v1869_v4 }
 0x425   : > { %3962 = vmatprep.subr.bf16.mxu0 %v4163_v17  ;;  %3965 = vmatprep.subr.bf16.mxu1 %v4163_v17  ;;  %v1934_v38 = vrot.slane %v1926_v51, %v4335_v33  ;;  %v1943_v27 = vcombine.high %v1886_v60, %v4777_v58 }
 0x426   : > { %v4764_v47 = vpop.permute.xlu1 %1572  ;;  %3857 = vmatmul.mubr.msk.f32.vlgmr.msra.gmra.mrb[6].mxu0 %vm979_vm2, %v1376_v48  ;;  %v4771_v18 = vpop.permute.xlu0 %1578  ;;  %3864 = vmatmul.mubr.msk.f32.vlgmr.msra.gmra.mrb[6].mxu1 %vm979_vm2, %v1377_v21  ;;  %v4784_v48 = vrot.slane %v1446_v34, %v4346_v8  ;;  %v1927_v21 = vcombine.high %v4713_v6, %v4734_v41  ;;  %v1741_v6 = vcombine.high %v1701_v57, %v1733_v59 }
 0x427   : > { %3964 = vmatpush3.bf16.msra.mxu0 %v3963_v16  ;;  %3967 = vmatpush3.bf16.msra.mxu1 %v3966_v63  ;;  %v2014_v42 = vcombine.low %v4534_v20, %v4764_v47  ;;  %v2030_v54 = vcombine.low %v4740_v36, %v4771_v18  ;;  %v1958_v32 = vcombine.low %v4793_v3, %v4787_v0 }
 0x428   : > { %3870 = vmatprep.mubr.msk.f32.mxu0 %vm4164_vm10, %v4162_v29  ;;  %3877 = vmatprep.mubr.msk.f32.mxu1 %vm4164_vm10, %v4162_v29  ;;  %v1918_v34 = vrot.slane %v1910_v2, %v4335_v33  ;;  %v3969_v35 = vpack.c.bf16 %v1876_v52, %v1740_v5  ;;  %v1959_v37 = vcombine.high %v4793_v3, %v4787_v0 }
 0x429   : > { %3968 = vmatprep.subr.bf16.mxu0 %v4163_v17  ;;  %3971 = vmatprep.subr.bf16.mxu1 %v4163_v17  ;;  %v3972_v19 = vpack.c.bf16 %v1877_v40, %v1741_v6  ;;  %v4829_v50 = vrot.slane %v1927_v21, %v4335_v33  ;;  %v2022_v26 = vrot.slane %v2014_v42, %v4335_v33 }
 0x42a   : > { %v1585_v10 = vpop.permute.xlu1 %1584  ;;  %v1591_v11 = vpop.permute.xlu0 %1590  ;;  %3871 = vmatmul.mubr.msk.f32.vlgmr.msra.gmra.mrb[8].mxu0 %vm979_vm2, %v1378_v61  ;;  %3878 = vmatmul.mubr.msk.f32.vlgmr.msra.gmra.mrb[8].mxu1 %vm979_vm2, %v1379_v62  ;;  %v1911_v61 = vcombine.high %v4698_v53, %v4715_v7  ;;  %v1974_v14 = vcombine.low %v1918_v34, %v1934_v38  ;;  %v2038_v25 = vrot.slane %v2030_v54, %v4335_v33 }
 0x42b   : > { %3970 = vmatpush3.bf16.msra.mxu0 %v3969_v35  ;;  %v1975_v30 = vcombine.high %v1918_v34, %v1934_v38  ;;  %3973 = vmatpush3.bf16.msra.mxu1 %v3972_v19  ;;  %v2015_v44 = vcombine.high %v4534_v20, %v4764_v47  ;;  %v2031_v22 = vcombine.high %v4740_v36, %v4771_v18 }
 0x42c   : > { %3884 = vmatprep.mubr.msk.f32.mxu0 %vm4164_vm10, %v4162_v29  ;;  %3891 = vmatprep.mubr.msk.f32.mxu1 %vm4164_vm10, %v4162_v29  ;;  %v4850_v20 = vrot.slane %v1911_v61, %v4335_v33  ;;  %v1982_v56 = vrot.slane %v1974_v14, %v4346_v8  ;;  %v2078_v49 = vcombine.low %v2022_v26, %v2038_v25 }
 0x42d   : > { %3974 = vmatprep.subr.bf16.mxu0 %v4163_v17  ;;  %3977 = vmatprep.subr.bf16.mxu1 %v4163_v17  ;;  %v1957_v13 = vrot.slane %v1943_v27, %v4346_v8  ;;  %v4862_v46 = vrot.slane %v1958_v32, %v4346_v8  ;;  %v1989_v18 = vrot.slane %v1975_v30, %v4346_v8 }
 0x42e   : > { %v1597_v62 = vpop.permute.xlu1 %1596  ;;  %v1603_v41 = vpop.permute.xlu0 %1602  ;;  %3885 = vmatmul.mubr.msk.f32.vlgmr.msra.gmra.mrb[10].mxu0 %vm979_vm2, %v1380_v12  ;;  %3892 = vmatmul.mubr.msk.f32.vlgmr.msra.gmra.mrb[10].mxu1 %vm979_vm2, %v1381_v9  ;;  %v1950_v12 = vrot.slane %v1942_v15, %v4346_v8  ;;  %v1990_v23 = vcombine.low %v4850_v20, %v4829_v50  ;;  %v2029_v16 = vrot.slane %v2015_v44, %v4335_v33 }
 0x42f   : > { %v2046_v53 = vcombine.low %v1585_v10, %v1597_v62  ;;  %v2062_v7 = vcombine.low %v1591_v11, %v1603_v41  ;;  %v2047_v59 = vcombine.high %v1585_v10, %v1597_v62  ;;  %v2063_v24 = vcombine.high %v1591_v11, %v1603_v41  ;;  %3898 = vmatprep.mubr.msk.f32.mxu0 %vm4164_vm10, %v4162_v29 }
 0x430   : > { %3905 = vmatprep.mubr.msk.f32.mxu1 %vm4164_vm10, %v4162_v29  ;;  %v2045_v57 = vrot.slane %v2031_v22, %v4335_v33  ;;  %v2079_v63 = vcombine.high %v2022_v26, %v2038_v25  ;;  %v2086_v2 = vrot.slane %v2078_v49, %v4346_v8  ;;  %v2006_v5 = vcombine.low %v1950_v12, %v1982_v56 }
 0x431   : > { %v2054_v4 = vrot.slane %v2046_v53, %v4335_v33  ;;  %v2070_v39 = vrot.slane %v2062_v7, %v4335_v33  ;;  %v2061_v28 = vrot.slane %v2047_v59, %v4335_v33  ;;  %v2077_v9 = vrot.slane %v2063_v24, %v4335_v33 }
 0x432   : > { %v1231_v36 = vpop.permute.xlu1 %1230  ;;  %v1225_v1 = vpop.permute.xlu0 %1224  ;;  %v2007_v40 = vcombine.high %v1950_v12, %v1982_v56  ;;  %v2094_v27 = vcombine.low %v2029_v16, %v2045_v57  ;;  %v2095_v32 = vcombine.high %v2029_v16, %v2045_v57  ;;  %v2093_v61 = vrot.slane %v2079_v63, %v4346_v8 }
 0x433   : > { %v2110_v51 = vcombine.low %v2054_v4, %v2070_v39  ;;  %v2111_v47 = vcombine.high %v2054_v4, %v2070_v39  ;;  %v2126_v11 = vcombine.low %v2061_v28, %v2077_v9  ;;  %v2127_v19 = vcombine.high %v2061_v28, %v2077_v9 }
 0x434   : > { %v1991_v59 = vcombine.high %v4850_v20, %v4829_v50  ;;  %v1998_v24 = vrot.slane %v1990_v23, %v4346_v8  ;;  %v2008_v4 = vcombine.low %v1957_v13, %v1989_v18  ;;  %v2102_v39 = vrot.slane %v2094_v27, %v4346_v8 }
 0x435   : > { %v2118_v58 = vrot.slane %v2110_v51, %v4346_v8  ;;  %v2125_v10 = vrot.slane %v2111_v47, %v4346_v8  ;;  %v2134_v53 = vrot.slane %v2126_v11, %v4346_v8  ;;  %v2109_v56 = vrot.slane %v2095_v32, %v4346_v8 }
 0x436   : > { %v1243_v52 = vpop.permute.xlu1 %1242  ;;  %v1237_v60 = vpop.permute.xlu0 %1236  ;;  %v2141_v49 = vrot.slane %v2127_v19, %v4346_v8  ;;  %v1973_v47 = vrot.slane %v1959_v37, %v4346_v8  ;;  %v2005_v16 = vrot.slane %v1991_v59, %v4346_v8 }
 0x437   : > { %v1430_v21 = vcombine.low %v1231_v36, %v1243_v52  ;;  %v1431_v38 = vcombine.high %v1231_v36, %v1243_v52  ;;  %v1414_v42 = vcombine.low %v1225_v1, %v1237_v60  ;;  %v1415_v54 = vcombine.high %v1225_v1, %v1237_v60 }
 0x438   : > { %v2142_v15 = vcombine.low %v2086_v2, %v2118_v58  ;;  %v2143_v6 = vcombine.high %v2086_v2, %v2118_v58  ;;  %v2144_v7 = vcombine.low %v2093_v61, %v2125_v10  ;;  %v2145_v44 = vcombine.high %v2093_v61, %v2125_v10 }
 0x439   : > { %v1438_v34 = vrot.slane %v1430_v21, %v4335_v33  ;;  %v1422_v35 = vrot.slane %v1414_v42, %v4335_v33  ;;  %v1445_v25 = vrot.slane %v1431_v38, %v4335_v33  ;;  %v1429_v62 = vrot.slane %v1415_v54, %v4335_v33 }
 0x43a   : > { %v3975_v14 = vpack.c.bf16 %v2142_v15, %v2006_v5  ;;  %v3978_v26 = vpack.c.bf16 %v2143_v6, %v2007_v40  ;;  %v2009_v36 = vcombine.high %v1957_v13, %v1989_v18  ;;  %v3981_v51 = vpack.c.bf16 %v2144_v7, %v2008_v4 }
 0x43b   : > { %v1478_v41 = vcombine.low %v1422_v35, %v1438_v34  ;;  %v1479_v30 = vcombine.high %v1422_v35, %v1438_v34  ;;  %v1494_v12 = vcombine.low %v1429_v62, %v1445_v25  ;;  %v2146_v28 = vcombine.low %v2102_v39, %v2134_v53 }
 0x43c   : > { %3976 = vmatpush3.bf16.msra.mxu0 %v3975_v14  ;;  %3979 = vmatpush3.bf16.msra.mxu1 %v3978_v26  ;;  %v3984_v23 = vpack.c.bf16 %v2145_v44, %v2009_v36  ;;  %v2147_v9 = vcombine.high %v2102_v39, %v2134_v53  ;;  %v2010_v13 = vcombine.low %v4862_v46, %v1998_v24 }
 0x43d   : > { %v1486_v22 = vrot.slane %v1478_v41, %v4346_v8  ;;  %3980 = vmatprep.subr.bf16.mxu0 %v4163_v17  ;;  %3983 = vmatprep.subr.bf16.mxu1 %v4163_v17  ;;  %v1493_v1 = vrot.slane %v1479_v30, %v4346_v8  ;;  %v1495_v18 = vcombine.high %v1429_v62, %v1445_v25 }
 0x43e   : > { %v2148_v57 = vcombine.low %v2109_v56, %v2141_v49  ;;  %v1502_v58 = vrot.slane %v1494_v12, %v4346_v8  ;;  %v3987_v3 = vpack.c.bf16 %v2146_v28, %v2010_v13  ;;  %v1463_v2 = vcombine.high %v4638_v45, %v4632_v43 }
 0x43f   : > { %v1510_v50 = vcombine.low %v4784_v48, %v1486_v22  ;;  %v1511_v20 = vcombine.high %v4784_v48, %v1486_v22  ;;  %v2011_v48 = vcombine.high %v4862_v46, %v1998_v24  ;;  %v1512_v63 = vcombine.low %v4805_v31, %v1493_v1 }
 0x440   : > { %v1513_v0 = vcombine.high %v4805_v31, %v1493_v1  ;;  %v2149_v46 = vcombine.high %v2109_v56, %v2141_v49  ;;  %v1470_v31 = vrot.slane %v1462_v55, %v4346_v8  ;;  %v2012_v52 = vcombine.low %v1973_v47, %v2005_v16 }
 0x441   : > { %3899 = vmatmul.mubr.msk.f32.vlgmr.msra.gmra.mrb[12].mxu0 %vm979_vm2, %v1510_v50  ;;  %3906 = vmatmul.mubr.msk.f32.vlgmr.msra.gmra.mrb[12].mxu1 %vm979_vm2, %v1511_v20  ;;  %v3990_v37 = vpack.c.bf16 %v2147_v9, %v2011_v48  ;;  %v2013_v60 = vcombine.high %v1973_v47, %v2005_v16  ;;  %v1509_v5 = vrot.slane %v1495_v18, %v4346_v8 }
 0x442   : > { %3982 = vmatpush3.bf16.msra.mxu0 %v3981_v51  ;;  %3985 = vmatpush3.bf16.msra.mxu1 %v3984_v23  ;;  %v1514_v40 = vcombine.low %v1470_v31, %v1502_v58  ;;  %v1515_v21 = vcombine.high %v1470_v31, %v1502_v58  ;;  %v3993_v43 = vpack.c.bf16 %v2148_v57, %v2012_v52 }
 0x443   : > { %3912 = vmatprep.mubr.msk.f32.mxu0 %vm4164_vm10, %v4162_v29  ;;  %3919 = vmatprep.mubr.msk.f32.mxu1 %vm4164_vm10, %v4162_v29  ;;  %v3996_v45 = vpack.c.bf16 %v2149_v46, %v2013_v60  ;;  %v1477_v55 = vrot.slane %v1463_v2, %v4346_v8 }
 0x444   : > { %3986 = vmatprep.subr.bf16.mxu0 %v4163_v17  ;;  %3989 = vmatprep.subr.bf16.mxu1 %v4163_v17 }
 0x445   : > { %3913 = vmatmul.mubr.msk.f32.vlgmr.msra.gmra.mrb[14].mxu0 %vm979_vm2, %v1512_v63  ;;  %3920 = vmatmul.mubr.msk.f32.vlgmr.msra.gmra.mrb[14].mxu1 %vm979_vm2, %v1513_v0  ;;  %v1516_v38 = vcombine.low %v1477_v55, %v1509_v5  ;;  %v1517_v42 = vcombine.high %v1477_v55, %v1509_v5 }
 0x446   : > { %3988 = vmatpush3.bf16.msra.mxu0 %v3987_v3  ;;  %3991 = vmatpush3.bf16.msra.mxu1 %v3990_v37 }
 0x447   : > { %3926 = vmatprep.mubr.msk.f32.mxu0 %vm4164_vm10, %v4162_v29  ;;  %3933 = vmatprep.mubr.msk.f32.mxu1 %vm4164_vm10, %v4162_v29 }
 0x448   : > { %3992 = vmatprep.subr.bf16.mxu0 %v4163_v17  ;;  %3995 = vmatprep.subr.bf16.mxu1 %v4163_v17 }
 0x449   : > { %3927 = vmatmul.mubr.msk.f32.vlgmr.msra.gmra.mrb[16].mxu0 %vm979_vm2, %v1514_v40  ;;  %3934 = vmatmul.mubr.msk.f32.vlgmr.msra.gmra.mrb[16].mxu1 %vm979_vm2, %v1515_v21 }
 0x44a   : > { %3994 = vmatpush3.bf16.msra.mxu0 %v3993_v43  ;;  %3997 = vmatpush3.bf16.msra.mxu1 %v3996_v45 }
 0x44b   : > { %3940 = vmatprep.mubr.msk.f32.mxu0 %vm4164_vm10, %v4162_v29  ;;  %3947 = vmatprep.mubr.msk.f32.mxu1 %vm4164_vm10, %v4162_v29 }
 0x44d   : > { %3941 = vmatmul.mubr.msk.f32.vlgmr.msra.gmra.mrb[18].mxu0 %vm979_vm2, %v1516_v38  ;;  %3948 = vmatmul.mubr.msk.f32.vlgmr.msra.gmra.mrb[18].mxu1 %vm979_vm2, %v1517_v42 }
 0x4f5   : > { %v2219_v17 = vpop.f32.mrb[4].mxu0  ;;  %v2292_v54 = vpop.f32.mrb[4].mxu1 }
 0x4f6   : > { %v3844_v10 = vpop.f32.mrb[5].mxu0  ;;  %v3851_v11 = vpop.f32.mrb[5].mxu1 }
 0x4f9   : > { %v2365_v15 = vpop.f32.mrb[6].mxu0  ;;  %v2438_v32 = vpop.f32.mrb[6].mxu1 }
 0x4fa   : > { %v3318_v6 = vcombine.low %v2219_v17, %v2365_v15  ;;  %v3319_v27 = vcombine.high %v2219_v17, %v2365_v15  ;;  %v3858_v34 = vpop.f32.mrb[7].mxu0  ;;  %v3334_v35 = vcombine.low %v2292_v54, %v2438_v32  ;;  %v3335_v61 = vcombine.high %v2292_v54, %v2438_v32  ;;  %v3865_v19 = vpop.f32.mrb[7].mxu1 }
 0x4fc   : > { %v3326_v14 = vrot.slane %v3318_v6, %v4335_v33  ;;  %v3333_v29 = vrot.slane %v3319_v27, %v4335_v33  ;;  %v3342_v26 = vrot.slane %v3334_v35, %v4335_v33  ;;  %v3349_v25 = vrot.slane %v3335_v61, %v4335_v33 }
 0x4fd   : > { %v2511_v62 = vpop.f32.mrb[8].mxu0  ;;  %v2584_v44 = vpop.f32.mrb[8].mxu1 }
 0x4fe   : > { %v3382_v41 = vcombine.low %v3326_v14, %v3342_v26  ;;  %v3383_v30 = vcombine.high %v3326_v14, %v3342_v26  ;;  %v3398_v53 = vcombine.low %v3333_v29, %v3349_v25  ;;  %v3399_v7 = vcombine.high %v3333_v29, %v3349_v25  ;;  %v3872_v59 = vpop.f32.mrb[9].mxu0  ;;  %v3879_v24 = vpop.f32.mrb[9].mxu1 }
 0x500   : > { %v4945_v13 = vrot.slane %v3382_v41, %v4346_v8  ;;  %v3397_v18 = vrot.slane %v3383_v30, %v4346_v8  ;;  %v3406_v48 = vrot.slane %v3398_v53, %v4346_v8  ;;  %v3413_v3 = vrot.slane %v3399_v7, %v4346_v8 }
 0x501   : > { %v2657_v22 = vpop.f32.mrb[10].mxu0  ;;  %v2730_v56 = vpop.f32.mrb[10].mxu1 }
 0x502   : > { %v3350_v4 = vcombine.low %v2511_v62, %v2657_v22  ;;  %v3351_v39 = vcombine.high %v2511_v62, %v2657_v22  ;;  %v3886_v49 = vpop.f32.mrb[11].mxu0  ;;  %v3366_v36 = vcombine.low %v2584_v44, %v2730_v56  ;;  %v3367_v1 = vcombine.high %v2584_v44, %v2730_v56  ;;  %v3893_v12 = vpop.f32.mrb[11].mxu1 }
 0x504   : > { %v3358_v50 = vrot.slane %v3350_v4, %v4335_v33  ;;  %v3365_v20 = vrot.slane %v3351_v39, %v4335_v33  ;;  %v3374_v51 = vrot.slane %v3366_v36, %v4335_v33  ;;  %v3381_v23 = vrot.slane %v3367_v1, %v4335_v33 }
 0x506   : > { %v3414_v28 = vcombine.low %v3358_v50, %v3374_v51  ;;  %v3415_v9 = vcombine.high %v3358_v50, %v3374_v51  ;;  %v3430_v47 = vcombine.low %v3365_v20, %v3381_v23  ;;  %v3431_v16 = vcombine.high %v3365_v20, %v3381_v23 }
 0x508   : > { %v4950_v57 = vrot.slane %v3414_v28, %v4346_v8  ;;  %v3429_v58 = vrot.slane %v3415_v9, %v4346_v8  ;;  %v3438_v63 = vrot.slane %v3430_v47, %v4346_v8  ;;  %v4955_v0 = vrot.slane %v3431_v16, %v4346_v8 }
 0x50a   : > { %v3447_v37 = vcombine.high %v4945_v13, %v4950_v57  ;;  %v3448_v46 = vcombine.low %v3397_v18, %v3429_v58  ;;  %v3449_v2 = vcombine.high %v3397_v18, %v3429_v58  ;;  %v3450_v31 = vcombine.low %v3406_v48, %v3438_v63 }
 0x50b   : > { %v3451_v52 = vcombine.high %v3406_v48, %v3438_v63  ;;  %v3452_v60 = vcombine.low %v3413_v3, %v4955_v0  ;;  %v3453_v5 = vcombine.high %v3413_v3, %v4955_v0  ;;  %v3446_v40 = vcombine.low %v4945_v13, %v4950_v57 }
 0x50c   : > { %3592 = vrot.lane.b32.xlu0 %v3447_v37, %s4158_s19 }
 0x510   : > { %3600 = vrot.lane.b32.xlu0 %v3448_v46, %s4156_s13 }
 0x514   : > { %v2803_v21 = vpop.f32.mrb[12].mxu0  ;;  %v2876_v43 = vpop.f32.mrb[12].mxu1  ;;  %3608 = vrot.lane.b32.xlu0 %v3449_v2, %s4155_s12 }
 0x515   : > { %v3900_v45 = vpop.f32.mrb[13].mxu0  ;;  %v3907_v55 = vpop.f32.mrb[13].mxu1 }
 0x518   : > { %v2949_v38 = vpop.f32.mrb[14].mxu0  ;;  %v3022_v42 = vpop.f32.mrb[14].mxu1  ;;  %3616 = vrot.lane.b32.xlu0 %v3450_v31, %s4154_s25 }
 0x519   : > { %v3454_v17 = vcombine.low %v2803_v21, %v2949_v38  ;;  %v3455_v54 = vcombine.high %v2803_v21, %v2949_v38  ;;  %v3470_v10 = vcombine.low %v2876_v43, %v3022_v42  ;;  %v3471_v11 = vcombine.high %v2876_v43, %v3022_v42  ;;  %v3914_v15 = vpop.f32.mrb[15].mxu0  ;;  %v3921_v6 = vpop.f32.mrb[15].mxu1 }
 0x51b   : > { %v3462_v27 = vrot.slane %v3454_v17, %v4335_v33  ;;  %v3469_v32 = vrot.slane %v3455_v54, %v4335_v33  ;;  %v3478_v34 = vrot.slane %v3470_v10, %v4335_v33  ;;  %v3485_v35 = vrot.slane %v3471_v11, %v4335_v33 }
 0x51c   : > { %v3095_v61 = vpop.f32.mrb[16].mxu0  ;;  %v3168_v19 = vpop.f32.mrb[16].mxu1  ;;  %3624 = vrot.lane.b32.xlu0 %v3451_v52, %s4152_s23 }
 0x51d   : > { %v3518_v14 = vcombine.low %v3462_v27, %v3478_v34  ;;  %v3519_v29 = vcombine.high %v3462_v27, %v3478_v34  ;;  %v3534_v26 = vcombine.low %v3469_v32, %v3485_v35  ;;  %v3535_v25 = vcombine.high %v3469_v32, %v3485_v35  ;;  %v3928_v62 = vpop.f32.mrb[17].mxu0  ;;  %v3935_v41 = vpop.f32.mrb[17].mxu1 }
 0x51f   : > { %v3526_v51 = vrot.slane %v3518_v14, %v4346_v8  ;;  %v3533_v23 = vrot.slane %v3519_v29, %v4346_v8  ;;  %v3542_v28 = vrot.slane %v3534_v26, %v4346_v8  ;;  %v3549_v18 = vrot.slane %v3535_v25, %v4346_v8 }
 0x520   : > { %v3241_v30 = vpop.f32.mrb[18].mxu0  ;;  %v3314_v53 = vpop.f32.mrb[18].mxu1  ;;  %3632 = vrot.lane.b32.xlu0 %v3452_v60, %s4153_s24 }
 0x521   : > { %v3486_v7 = vcombine.low %v3095_v61, %v3241_v30  ;;  %v3487_v44 = vcombine.high %v3095_v61, %v3241_v30  ;;  %v3502_v59 = vcombine.low %v3168_v19, %v3314_v53  ;;  %v3503_v24 = vcombine.high %v3168_v19, %v3314_v53  ;;  %v3942_v22 = vpop.f32.mrb[19].mxu0  ;;  %v3949_v4 = vpop.f32.mrb[19].mxu1 }
 0x523   : > { %v3494_v39 = vrot.slane %v3486_v7, %v4335_v33  ;;  %v3501_v56 = vrot.slane %v3487_v44, %v4335_v33  ;;  %v3510_v49 = vrot.slane %v3502_v59, %v4335_v33  ;;  %v3517_v36 = vrot.slane %v3503_v24, %v4335_v33 }
 0x524   : > { %3640 = vrot.lane.b32.xlu0 %v3453_v5, %s4151_s22 }
 0x525   : > { %v3550_v1 = vcombine.low %v3494_v39, %v3510_v49  ;;  %v3551_v12 = vcombine.high %v3494_v39, %v3510_v49  ;;  %v3566_v50 = vcombine.low %v3501_v56, %v3517_v36  ;;  %v3567_v20 = vcombine.high %v3501_v56, %v3517_v36 }
 0x527   : > { %v3558_v9 = vrot.slane %v3550_v1, %v4346_v8  ;;  %v3565_v47 = vrot.slane %v3551_v12, %v4346_v8  ;;  %v3574_v16 = vrot.slane %v3566_v50, %v4346_v8  ;;  %v3581_v33 = vrot.slane %v3567_v20, %v4346_v8 }
 0x529   : > { %v3583_v48 = vcombine.high %v3526_v51, %v3558_v9  ;;  %v3584_v58 = vcombine.low %v3533_v23, %v3565_v47  ;;  %v3585_v63 = vcombine.high %v3533_v23, %v3565_v47  ;;  %v3586_v0 = vcombine.low %v3542_v28, %v3574_v16 }
 0x52a   : > { %v3587_v3 = vcombine.high %v3542_v28, %v3574_v16  ;;  %v3588_v37 = vcombine.low %v3549_v18, %v3581_v33  ;;  %v3589_v46 = vcombine.high %v3549_v18, %v3581_v33  ;;  %v3582_v2 = vcombine.low %v3526_v51, %v3558_v9 }
 0x52b   : > { %3594 = vrot.lane.b32.xlu1 %v3583_v48, %s4158_s19 }
 0x52f   : > { %3602 = vrot.lane.b32.xlu1 %v3584_v58, %s4156_s13 }
 0x533   : > { %3610 = vrot.lane.b32.xlu1 %v3585_v63, %s4155_s12 }
 0x537   : > { %3618 = vrot.lane.b32.xlu1 %v3586_v0, %s4154_s25  ;;  %s3773_s25 = sshll.u32 %s4234_s9, 8  ;;  %s5024_s9 = scalar_lea.sflag [#allocation3], %s294_s17 }
 0x538   : > { %s5019_s19 = scalar_lea.hbm %s5073_s8, %s3773_s25 }
 0x53b   : > { %3626 = vrot.lane.b32.xlu1 %v3587_v3, %s4152_s23  ;;  %s3742_s23 = sshll.u32 %s294_s17, 4 }
 0x53f   : > { %3634 = vrot.lane.b32.xlu1 %v3588_v37, %s4153_s24 }
 0x543   : > { %3642 = vrot.lane.b32.xlu1 %v3589_v46, %s4151_s22  ;;  %s296_s22 = scalar_lea.vmem [#allocation2], %s3742_s23 }
 0x544   : > { %s3676_s24 = sshll.u32 %s296_s22, 4  ;;  %s5012_s24 = int_to_ptr.vmem [resolvable:$true] %s3676_s24 }
 0x545   : > { %s4087_s18 = scalar_lea.vmem %s5012_s24, 256  ;;  %p4094_p0 = scmp.lt.s32.totalorder %s5012_s24, %s4092_s21 }
 0x546   : > { %p4088_p11 = scmp.ne.s32.totalorder %s5012_s24, %s4087_s18  ;;  %p4095_p1 = scmp.lt.s32.totalorder %s4093_s26, %s4087_s18 }
 0x548   : > { %p4089_p12 = pnand %p4088_p11, %p4251_p5  ;;  %p4096_p2 = por %p4095_p1, %p4094_p0 }
 0x54a   : > { %p4090_p13 = pneg %p4089_p12 }
 0x54c   : > { %p4097_p3 = pnand %p4096_p2, %p4090_p13 }
 0x57e   : > { %v3593_v8 = vpop.permute.xlu0 %3592 }
 0x57f   : > { %v3646_v21 = vsel %vm979_vm2, %v3446_v40, %v3593_v8 }
 0x582   : > { %v3601_v31 = vpop.permute.xlu0 %3600 }
 0x583   : > { %v3648_v43 = vsel %vm981_vm3, %v3646_v21, %v3601_v31 }
 0x586   : > { %v3609_v52 = vpop.permute.xlu0 %3608 }
 0x587   : > { %v3650_v55 = vsel %vm983_vm4, %v3648_v43, %v3609_v52 }
 0x58a   : > { %v3617_v60 = vpop.permute.xlu0 %3616 }
 0x58b   : > { %v3652_v38 = vsel %vm985_vm5, %v3650_v55, %v3617_v60 }
 0x58e   : > { %v3625_v5 = vpop.permute.xlu0 %3624 }
 0x58f   : > { %v3654_v42 = vsel %vm987_vm6, %v3652_v38, %v3625_v5 }
 0x592   : > { %v3633_v45 = vpop.permute.xlu0 %3632 }
 0x593   : > { %v3656_v17 = vsel %vm989_vm7, %v3654_v42, %v3633_v45 }
 0x596   : > { %v3641_v54 = vpop.permute.xlu0 %3640 }
 0x597   : > { %v3658_v10 = vsel %vm991_vm8, %v3656_v17, %v3641_v54 }
 0x598   : > { %3660 = vst [vmem:[%s296_s22] sm:$0xff] %v3658_v10 }
 0x59d   : > { %v3595_v13 = vpop.permute.xlu1 %3594 }
 0x59e   : > { %v3647_v6 = vsel %vm979_vm2, %v3582_v2, %v3595_v13 }
 0x5a1   : > { %v3603_v57 = vpop.permute.xlu1 %3602 }
 0x5a2   : > { %v3649_v27 = vsel %vm981_vm3, %v3647_v6, %v3603_v57 }
 0x5a5   : > { %v3611_v40 = vpop.permute.xlu1 %3610 }
 0x5a6   : > { %v3651_v34 = vsel %vm983_vm4, %v3649_v27, %v3611_v40 }
 0x5a9   : > { %v3619_v11 = vpop.permute.xlu1 %3618 }
 0x5aa   : > { %v3653_v35 = vsel %vm985_vm5, %v3651_v34, %v3619_v11 }
 0x5ad   : > { %v3627_v15 = vpop.permute.xlu1 %3626 }
 0x5ae   : > { %v3655_v61 = vsel %vm987_vm6, %v3653_v35, %v3627_v15 }
 0x5b1   : > { %v3635_v32 = vpop.permute.xlu1 %3634 }
 0x5b2   : > { %v3657_v19 = vsel %vm989_vm7, %v3655_v61, %v3635_v32 }
 0x5b5   : > { %v3643_v14 = vpop.permute.xlu1 %3642 }
 0x5b6   : > { %v3659_v29 = vsel %vm991_vm8, %v3657_v19, %v3643_v14 }
 0x5b7   : > { %3661 = vst [vmem:[%s296_s22 + $0x8] sm:$0xff] %v3659_v29 }
 0x5b8   : > { %4100 = shalt.err (!%p4097_p3)
}
 0x5b9   : > { %s4101_s10 = scalar_lea.hbm %s5019_s19, 256  ;;  %s4105_s22 = scalar_lea.hbm %s5073_s8, 512 }
 0x5ba   : > { %p4102_p4 = scmp.ne.s32.totalorder %s5019_s19, %s4101_s10  ;;  %p4106_p9 = scmp.lt.u32.totalorder %s5019_s19, %s5073_s8 }
 0x5bb   : > { %p4107_p10 = scmp.lt.u32.totalorder %s4105_s22, %s4101_s10  ;;  %p4109_p12 = scmp.lt.u32.totalorder %s4101_s10, %s5019_s19 }
 0x5bc   : > { %p4103_p7 = pnand %p4102_p4, %p4251_p5 }
 0x5bd   : > { %p4108_p11 = por %p4107_p10, %p4106_p9 }
 0x5be   : > { %p4104_p8 = pneg %p4103_p7 }
 0x5bf   : > { %p4110_p13 = por %p4109_p12, %p4108_p11 }
 0x5c1   : > { %p4111_p0 = pnand %p4110_p13, %p4104_p8 }
 0x5c3   : > { %4114 = shalt.err (!%p4111_p0)
}
 0x5c4   : > { %s4166_s13 = smov 128   ;;  %s4167_s18 = smov 8  }
 0x5c5   : > { %3998 = dma.vmem_to_hbm [thread:$0]  (%p4251_p5), %s5012_s24, 256, %s5019_s19, %s5024_s9, %s4166_s13, %s4166_s13, %s4167_s18  }
 0x5c6 PF: > { %p4004_p1 = scmp.ge.s32.totalorder %s4149_s30, 2  ;;  %s3691_s20 = sand.u32 1, %s4137_s27  }
 0x5c7   : > { %s3692_s21 = scalar_lea.sflag [#allocation3], %s3691_s20 }
 0x5c8   : > { %p4001_p2 = pnand %p4004_p1, %p4255_p6 }
 0x5ca   : > { %4132 = dma.done.wait (!%p4001_p2), %s3692_s21, 256  }
 0x5cb   : > { %4134 = vsyncadd (!%p4001_p2), %s3692_s21, 4294967040  ;;  %p18_p3 = scmp.ge.s32.totalorder %s4238_s11, 4   ;;  %s5076_s27 = smov %s4141_s28 }
 0x5cc   : > { %s5077_s28 = smov %s4145_s29  ;;  %s5078_s29 = smov %s4249_s14 }
 0x5cd   : > { %s5079_s30 = smov %s4238_s11  ;;  %20 = sbr.rel (!%p18_p3) target bundleno = 3 (0x3), region = 87 }
 0x5d4   :  { %3697 = vsyncpa [#allocation3], 1 }
 0x5d5   :  { %3699 = vsyncpa [#allocation3 + $0x1], 1 }

</bundles_post_ra>
